<compile_context>
chip_gen: v7x
topology: tpu7x:2x2x1
jax: 0.10.0
libtpu: 0.0.40
codegen_flags: <defaults>
</compile_context>

<pallas_src>
import functools

import jax
import jax.numpy as jnp
from jax import lax
from jax.experimental import pallas as pl
from jax.experimental.pallas import tpu as pltpu

EPS = 1e-5
LANE = 128       # lane width: pad conv output channels to this
K_PACK = 16      # bf16 sublane pack: pad conv input channels to this


def _round_up(x, m):
    return (x + m - 1) // m * m


def down_kernel(x_ref, w1_ref, s1_ref, b1_ref, w2_ref, s2_ref, b2_ref, o_ref):
    # x_ref : (1, Hp, Wp, 4*Cin_p) bf16  2x2 pool window packed on the lane axis
    # w*_ref: (9*Cin_p, Cmid_p) / (9*Cmid_p, Cout_p) bf16 im2col weights,
    #         K ordering = (kh, kw, cin)
    # s*,b* : (1, C_p) f32  folded BN scale / bias
    # o_ref : (Hp*Wp, Cout_p) f32  lane-dense output slab (no transpose)
    nb, hp, wp, c4 = x_ref.shape
    cin = c4 // 4
    m = nb * hp * wp

    x = x_ref[...]                                           # bf16
    # ---- 2x2 max pool, stride 2: max over the 4 packed window positions ----
    pooled = jnp.maximum(
        jnp.maximum(x[..., 0 * cin:1 * cin], x[..., 1 * cin:2 * cin]),
        jnp.maximum(x[..., 2 * cin:3 * cin], x[..., 3 * cin:4 * cin]))

    def conv_bn_relu(feat, w_ref, s_ref, b_ref):
        # feat: (nb, hp, wp, c) bf16 -> (m, cout) f32 after folded BN + ReLU
        c = feat.shape[-1]
        cout = w_ref.shape[-1]
        # zero halo (padding=1) built by value-level concatenation
        zrow = jnp.zeros((nb, 1, wp, c), feat.dtype)
        t = jnp.concatenate([zrow, feat, zrow], axis=1)       # (nb, hp+2, wp,   c)
        zcol = jnp.zeros((nb, hp + 2, 1, c), feat.dtype)
        padded = jnp.concatenate([zcol, t, zcol], axis=2)     # (nb, hp+2, wp+2, c)

        if c >= 64:
            # Large channel count: 9 accumulated MXU dots over the shifted
            # windows. No 9x materialized im2col buffer, no lane-axis concats.
            acc = jnp.zeros((m, cout), jnp.float32)
            for dh in range(3):
                for dw in range(3):
                    win = padded[:, dh:dh + hp, dw:dw + wp, :].reshape(m, c)
                    wk = w_ref[pl.ds((dh * 3 + dw) * c, c), :]
                    acc = acc + jnp.dot(win, wk,
                                        preferred_element_type=jnp.float32)
        else:
            # Tiny channel count: single im2col matmul (better MXU cadence).
            pieces = [padded[:, dh:dh + hp, dw:dw + wp, :]
                      for dh in range(3) for dw in range(3)]
            patches = jnp.concatenate(pieces, axis=-1).reshape(m, 9 * c)
            acc = jnp.dot(patches, w_ref[...],
                          preferred_element_type=jnp.float32)
        # folded BN + ReLU in f32
        return jnp.maximum(acc * s_ref[...] + b_ref[...], 0.0)

    h1 = conv_bn_relu(pooled, w1_ref, s1_ref, b1_ref)         # (m, Cmid_p) f32
    cmid = h1.shape[-1]
    h1b = h1.astype(jnp.bfloat16).reshape(nb, hp, wp, cmid)
    h2 = conv_bn_relu(h1b, w2_ref, s2_ref, b2_ref)            # (m, Cout_p) f32
    # Lane-dense store: Cout_p (multiple of 128) on the lane axis, spatial on
    # sublanes -- unmasked vst, no end-of-kernel transpose.
    o_ref[...] = h2.astype(o_ref.dtype)


@functools.partial(jax.jit, static_argnames=("out_ch",))
def down_forward(x_nchw, w1, s1, b1, w2, s2, b2, *, out_ch):
    """x_nchw: (N, Cin, H, W) f32 -> (N, out_ch, H//2, W//2) f32."""
    N, Cin, H, W = x_nchw.shape
    assert H % 2 == 0 and W % 2 == 0
    Hp, Wp = H // 2, W // 2
    cin_p = w1.shape[0] // 9          # padded input channels (from fold_layer)
    Cmid_p = w1.shape[1]
    Cout_p = w2.shape[1]
    assert w2.shape[0] == 9 * Cmid_p and cin_p >= Cin

    # Cast to bf16 up front (halves input DMA and all in-kernel copies), pad
    # input channels to the folded-weight padding, and pack the 2x2 pooling
    # window onto the lane axis with ONE XLA transpose.
    x = x_nchw.astype(jnp.bfloat16)
    if cin_p > Cin:
        x = jnp.pad(x, ((0, 0), (0, cin_p - Cin), (0, 0), (0, 0)))
    xp = x.reshape(N, cin_p, Hp, 2, Wp, 2)
    xp = jnp.transpose(xp, (0, 2, 4, 3, 5, 1)).reshape(N, Hp, Wp, 4 * cin_p)

    grid = (N,)                       # one image per step: >=2 parallel blocks
    m_blk = Hp * Wp

    flops = 2 * N * m_blk * 9 * (cin_p * Cmid_p + Cmid_p * Cout_p)
    bytes_accessed = (xp.size * 2 + w1.size * 2 + w2.size * 2
                      + (s1.size + b1.size + s2.size + b2.size) * 4
                      + N * m_blk * Cout_p * 4)

    out = pl.pallas_call(
        down_kernel,
        out_shape=jax.ShapeDtypeStruct((N * m_blk, Cout_p), jnp.float32),
        grid_spec=pltpu.PrefetchScalarGridSpec(
            num_scalar_prefetch=0,
            grid=grid,
            in_specs=[
                pl.BlockSpec((1, Hp, Wp, 4 * cin_p), lambda n: (n, 0, 0, 0)),
                pl.BlockSpec((9 * cin_p, Cmid_p), lambda n: (0, 0)),
                pl.BlockSpec((1, Cmid_p), lambda n: (0, 0)),
                pl.BlockSpec((1, Cmid_p), lambda n: (0, 0)),
                pl.BlockSpec((9 * Cmid_p, Cout_p), lambda n: (0, 0)),
                pl.BlockSpec((1, Cout_p), lambda n: (0, 0)),
                pl.BlockSpec((1, Cout_p), lambda n: (0, 0)),
            ],
            out_specs=pl.BlockSpec((m_blk, Cout_p), lambda n: (n, 0)),
        ),
        compiler_params=pltpu.CompilerParams(
            dimension_semantics=("parallel",),
            vmem_limit_bytes=32 * 1024 * 1024),
        cost_estimate=pl.CostEstimate(flops=flops, transcendentals=0,
                                      bytes_accessed=bytes_accessed),
    )(xp, w1, s1, b1, w2, s2, b2)

    # (N*Hp*Wp, Cout_p) -> strip channel pad -> NCHW
    out = out.reshape(N, Hp, Wp, Cout_p)[..., :out_ch]
    return jnp.transpose(out, (0, 3, 1, 2))


def make_params(key, in_ch, out_ch):
    """Deterministic synthetic parameters for conv/BN layers (PyTorch shapes)."""
    ks = jax.random.split(key, 12)

    def layer(kw, kb, kg, kbe, km, kv, cin, cout):
        w_oihw = 0.2 * jax.random.normal(kw, (cout, cin, 3, 3), jnp.float32)
        conv_b = 0.1 * jax.random.normal(kb, (cout,), jnp.float32)
        gamma = 1.0 + 0.1 * jax.random.normal(kg, (cout,), jnp.float32)
        beta = 0.1 * jax.random.normal(kbe, (cout,), jnp.float32)
        mean = 0.1 * jax.random.normal(km, (cout,), jnp.float32)
        var = jnp.abs(jax.random.normal(kv, (cout,), jnp.float32)) + 0.5
        return (w_oihw, conv_b, gamma, beta, mean, var)

    l1 = layer(*ks[0:6], in_ch, out_ch)
    l2 = layer(*ks[6:12], out_ch, out_ch)
    return l1, l2


def fold_layer(raw, cin_pad, cout_pad):
    """Fold conv-bias + BN (eval mode), pad channels, reshape for im2col."""
    w_oihw, conv_b, gamma, beta, mean, var = raw
    cout, cin = w_oihw.shape[0], w_oihw.shape[1]
    scale = gamma / jnp.sqrt(var + EPS)
    bias = (conv_b - mean) * scale + beta
    # zero-pad I -> cin_pad (K multiple of bf16 pack) and O -> cout_pad (lane
    # width); padded outputs get scale=bias=0 so they stay exactly 0 after ReLU.
    w = jnp.pad(w_oihw, ((0, cout_pad - cout), (0, cin_pad - cin),
                         (0, 0), (0, 0)))
    # OIHW -> HWIO -> (9*cin_pad, cout_pad); K ordering = (kh, kw, cin) matches
    # both in-kernel conv paths. bf16 for the MXU.
    w_mat = jnp.transpose(w, (2, 3, 1, 0)).reshape(9 * cin_pad, cout_pad)
    scale_p = jnp.pad(scale, (0, cout_pad - cout)).astype(jnp.float32)
    bias_p = jnp.pad(bias, (0, cout_pad - cout)).astype(jnp.float32)
    return w_mat.astype(jnp.bfloat16), scale_p[None, :], bias_p[None, :]


def reference_forward(x_nchw, layers, matmul_dtype=jnp.float32):
    """Pure-JAX/XLA reference of the PyTorch module (eval mode).

    matmul_dtype=bf16 mirrors the kernel's cast-at-the-dot-boundary so the
    kernel mechanics can be checked tightly; f32 is the true PyTorch module.
    """
    x = lax.reduce_window(x_nchw, -jnp.inf, lax.max,
                          (1, 1, 2, 2), (1, 1, 2, 2), "VALID")
    for (w, cb, g, be, m, v) in layers:
        y = lax.conv_general_dilated(
            x.astype(matmul_dtype), w.astype(matmul_dtype),
            window_strides=(1, 1), padding=((1, 1), (1, 1)),
            dimension_numbers=("NCHW", "OIHW", "NCHW"),
            preferred_element_type=jnp.float32)
        y = y + cb[None, :, None, None]
        y = (y - m[None, :, None, None]) / jnp.sqrt(v[None, :, None, None] + EPS)
        y = y * g[None, :, None, None] + be[None, :, None, None]
        x = jnp.maximum(y, 0.0)
    return x


if __name__ == "__main__":
    in_ch, out_ch = 4, 8
    N, H, W = 2, 16, 16

    key = jax.random.PRNGKey(0)
    kx, kp = jax.random.split(key)
    x = jax.random.normal(kx, (N, in_ch, H, W), jnp.float32)

    l1, l2 = make_params(kp, in_ch, out_ch)

    cin_p = _round_up(in_ch, K_PACK)     # K1 = 9*cin_p multiple of 16 (bf16)
    cmid_p = _round_up(out_ch, LANE)     # lane-width outputs -> unmasked vst
    cout_p = _round_up(out_ch, LANE)

    w1, s1, b1 = fold_layer(l1, cin_p, cmid_p)
    w2, s2, b2 = fold_layer(l2, cmid_p, cout_p)

    out = jax.block_until_ready(
        down_forward(x, w1, s1, b1, w2, s2, b2, out_ch=out_ch))

    # bf16-consistent reference: checks the kernel mechanics tightly.
    ref_bf16 = jax.block_until_ready(
        reference_forward(x, (l1, l2), matmul_dtype=jnp.bfloat16))
    # true f32 module: looser tolerance accounts for bf16 matmul inputs.
    ref_f32 = jax.block_until_ready(reference_forward(x, (l1, l2)))

    assert out.shape == (N, out_ch, H // 2, W // 2), out.shape
    err_bf16 = float(jnp.max(jnp.abs(out - ref_bf16)))
    err_f32 = float(jnp.max(jnp.abs(out - ref_f32)))
    assert jnp.allclose(out, ref_bf16, atol=2e-2, rtol=2e-2), (
        "mismatch vs bf16-consistent reference, max err %g" % err_bf16)
    assert jnp.allclose(out, ref_f32, atol=1e-1, rtol=5e-2), (
        "mismatch vs f32 reference, max err %g" % err_f32)

    print("KERNEL_OK")
</pallas_src>

<mosaic_0001>
module attributes {stable_mosaic.version = 11 : i64} {
  func.func @down_kernel(%arg0: i32, %arg1: memref<1x8x8x64xbf16, #tpu.memory_space<vmem>>, %arg2: memref<144x128xbf16, #tpu.memory_space<vmem>>, %arg3: memref<1x128xf32, #tpu.memory_space<vmem>>, %arg4: memref<1x128xf32, #tpu.memory_space<vmem>>, %arg5: memref<1152x128xbf16, #tpu.memory_space<vmem>>, %arg6: memref<1x128xf32, #tpu.memory_space<vmem>>, %arg7: memref<1x128xf32, #tpu.memory_space<vmem>>, %arg8: memref<64x128xf32, #tpu.memory_space<vmem>>) attributes {dimension_semantics = [#tpu.dimension_semantics<parallel>], iteration_bounds = array<i64: 2>, scalar_prefetch = 0 : i64, scratch_operands = 0 : i64, tpu.core_type = #tpu.core_type<tc>, window_params = [{transform_indices = @transform_0, window_bounds = array<i64: 1, 8, 8, 64>}, {pipeline_mode = #tpu.pipeline_mode<synchronous>, transform_indices = @transform_1, window_bounds = array<i64: 144, 128>}, {pipeline_mode = #tpu.pipeline_mode<synchronous>, transform_indices = @transform_2, window_bounds = array<i64: 1, 128>}, {pipeline_mode = #tpu.pipeline_mode<synchronous>, transform_indices = @transform_3, window_bounds = array<i64: 1, 128>}, {pipeline_mode = #tpu.pipeline_mode<synchronous>, transform_indices = @transform_4, window_bounds = array<i64: 1152, 128>}, {pipeline_mode = #tpu.pipeline_mode<synchronous>, transform_indices = @transform_5, window_bounds = array<i64: 1, 128>}, {pipeline_mode = #tpu.pipeline_mode<synchronous>, transform_indices = @transform_6, window_bounds = array<i64: 1, 128>}, {transform_indices = @transform_7, window_bounds = array<i64: 64, 128>}]} {
    %c0 = arith.constant 0 : index
    %c0_0 = arith.constant 0 : index
    %c0_1 = arith.constant 0 : index
    %c0_2 = arith.constant 0 : index
    %0 = vector.load %arg1[%c0, %c0_0, %c0_1, %c0_2] : memref<1x8x8x64xbf16, #tpu.memory_space<vmem>>, vector<1x8x8x64xbf16>
    %1 = vector.extract_strided_slice %0 {offsets = [0, 0, 0, 0], sizes = [1, 8, 8, 16], strides = [1, 1, 1, 1]} : vector<1x8x8x64xbf16> to vector<1x8x8x16xbf16>
    %2 = vector.extract_strided_slice %0 {offsets = [0, 0, 0, 16], sizes = [1, 8, 8, 16], strides = [1, 1, 1, 1]} : vector<1x8x8x64xbf16> to vector<1x8x8x16xbf16>
    %3 = arith.maximumf %1, %2 : vector<1x8x8x16xbf16>
    %4 = vector.extract_strided_slice %0 {offsets = [0, 0, 0, 32], sizes = [1, 8, 8, 16], strides = [1, 1, 1, 1]} : vector<1x8x8x64xbf16> to vector<1x8x8x16xbf16>
    %5 = vector.extract_strided_slice %0 {offsets = [0, 0, 0, 48], sizes = [1, 8, 8, 16], strides = [1, 1, 1, 1]} : vector<1x8x8x64xbf16> to vector<1x8x8x16xbf16>
    %6 = arith.maximumf %4, %5 : vector<1x8x8x16xbf16>
    %7 = arith.maximumf %3, %6 : vector<1x8x8x16xbf16>
    %cst = arith.constant 0.000000e+00 : bf16
    %8 = vector.broadcast %cst : bf16 to vector<1x1x8x16xbf16>
    %9 = tpu.concatenate %8, %7, %8 in 1 : vector<1x1x8x16xbf16>, vector<1x8x8x16xbf16>, vector<1x1x8x16xbf16> -> vector<1x10x8x16xbf16>
    %cst_3 = arith.constant 0.000000e+00 : bf16
    %10 = vector.broadcast %cst_3 : bf16 to vector<1x10x1x16xbf16>
    %11 = tpu.concatenate %10, %9, %10 in 2 : vector<1x10x1x16xbf16>, vector<1x10x8x16xbf16>, vector<1x10x1x16xbf16> -> vector<1x10x10x16xbf16>
    %12 = vector.extract_strided_slice %11 {offsets = [0, 0, 0, 0], sizes = [1, 8, 8, 16], strides = [1, 1, 1, 1]} : vector<1x10x10x16xbf16> to vector<1x8x8x16xbf16>
    %13 = vector.extract_strided_slice %11 {offsets = [0, 0, 1, 0], sizes = [1, 8, 8, 16], strides = [1, 1, 1, 1]} : vector<1x10x10x16xbf16> to vector<1x8x8x16xbf16>
    %14 = vector.extract_strided_slice %11 {offsets = [0, 0, 2, 0], sizes = [1, 8, 8, 16], strides = [1, 1, 1, 1]} : vector<1x10x10x16xbf16> to vector<1x8x8x16xbf16>
    %15 = vector.extract_strided_slice %11 {offsets = [0, 1, 0, 0], sizes = [1, 8, 8, 16], strides = [1, 1, 1, 1]} : vector<1x10x10x16xbf16> to vector<1x8x8x16xbf16>
    %16 = vector.extract_strided_slice %11 {offsets = [0, 1, 1, 0], sizes = [1, 8, 8, 16], strides = [1, 1, 1, 1]} : vector<1x10x10x16xbf16> to vector<1x8x8x16xbf16>
    %17 = vector.extract_strided_slice %11 {offsets = [0, 1, 2, 0], sizes = [1, 8, 8, 16], strides = [1, 1, 1, 1]} : vector<1x10x10x16xbf16> to vector<1x8x8x16xbf16>
    %18 = vector.extract_strided_slice %11 {offsets = [0, 2, 0, 0], sizes = [1, 8, 8, 16], strides = [1, 1, 1, 1]} : vector<1x10x10x16xbf16> to vector<1x8x8x16xbf16>
    %19 = vector.extract_strided_slice %11 {offsets = [0, 2, 1, 0], sizes = [1, 8, 8, 16], strides = [1, 1, 1, 1]} : vector<1x10x10x16xbf16> to vector<1x8x8x16xbf16>
    %20 = vector.extract_strided_slice %11 {offsets = [0, 2, 2, 0], sizes = [1, 8, 8, 16], strides = [1, 1, 1, 1]} : vector<1x10x10x16xbf16> to vector<1x8x8x16xbf16>
    %21 = tpu.concatenate %12, %13, %14, %15, %16, %17, %18, %19, %20 in 3 : vector<1x8x8x16xbf16>, vector<1x8x8x16xbf16>, vector<1x8x8x16xbf16>, vector<1x8x8x16xbf16>, vector<1x8x8x16xbf16>, vector<1x8x8x16xbf16>, vector<1x8x8x16xbf16>, vector<1x8x8x16xbf16>, vector<1x8x8x16xbf16> -> vector<1x8x8x144xbf16>
    %22 = vector.shape_cast %21 : vector<1x8x8x144xbf16> to vector<64x144xbf16>
    %c0_4 = arith.constant 0 : index
    %c0_5 = arith.constant 0 : index
    %23 = vector.load %arg2[%c0_4, %c0_5] : memref<144x128xbf16, #tpu.memory_space<vmem>>, vector<144x128xbf16>
    %cst_6 = arith.constant dense<0.000000e+00> : vector<64x128xf32>
    %24 = tpu.matmul %22, %23, %cst_6 {dimension_numbers = #tpu.dot_dimension_numbers<[1], [0], [0], [1], [0, 0, 1, 1], [], []>} : vector<64x144xbf16>, vector<144x128xbf16>, vector<64x128xf32> -> vector<64x128xf32>
    %c0_7 = arith.constant 0 : index
    %c0_8 = arith.constant 0 : index
    %25 = vector.load %arg3[%c0_7, %c0_8] : memref<1x128xf32, #tpu.memory_space<vmem>>, vector<1x128xf32>
    %26 = vector.broadcast %25 : vector<1x128xf32> to vector<64x128xf32>
    %27 = arith.mulf %24, %26 : vector<64x128xf32>
    %c0_9 = arith.constant 0 : index
    %c0_10 = arith.constant 0 : index
    %28 = vector.load %arg4[%c0_9, %c0_10] : memref<1x128xf32, #tpu.memory_space<vmem>>, vector<1x128xf32>
    %29 = vector.broadcast %28 : vector<1x128xf32> to vector<64x128xf32>
    %30 = arith.addf %27, %29 : vector<64x128xf32>
    %cst_11 = arith.constant 0.000000e+00 : f32
    %31 = vector.broadcast %cst_11 : f32 to vector<64x128xf32>
    %32 = arith.maximumf %30, %31 : vector<64x128xf32>
    %33 = arith.truncf %32 : vector<64x128xf32> to vector<64x128xbf16>
    %34 = vector.shape_cast %33 : vector<64x128xbf16> to vector<1x8x8x128xbf16>
    %cst_12 = arith.constant 0.000000e+00 : bf16
    %35 = vector.broadcast %cst_12 : bf16 to vector<1x1x8x128xbf16>
    %36 = tpu.concatenate %35, %34, %35 in 1 : vector<1x1x8x128xbf16>, vector<1x8x8x128xbf16>, vector<1x1x8x128xbf16> -> vector<1x10x8x128xbf16>
    %cst_13 = arith.constant 0.000000e+00 : bf16
    %37 = vector.broadcast %cst_13 : bf16 to vector<1x10x1x128xbf16>
    %38 = tpu.concatenate %37, %36, %37 in 2 : vector<1x10x1x128xbf16>, vector<1x10x8x128xbf16>, vector<1x10x1x128xbf16> -> vector<1x10x10x128xbf16>
    %cst_14 = arith.constant 0.000000e+00 : f32
    %39 = vector.broadcast %cst_14 : f32 to vector<64x128xf32>
    %40 = vector.extract_strided_slice %38 {offsets = [0, 0, 0, 0], sizes = [1, 8, 8, 128], strides = [1, 1, 1, 1]} : vector<1x10x10x128xbf16> to vector<1x8x8x128xbf16>
    %41 = vector.shape_cast %40 : vector<1x8x8x128xbf16> to vector<64x128xbf16>
    %c0_15 = arith.constant 0 : index
    %c0_16 = arith.constant 0 : index
    %42 = vector.load %arg5[%c0_15, %c0_16] : memref<1152x128xbf16, #tpu.memory_space<vmem>>, vector<128x128xbf16>
    %cst_17 = arith.constant dense<0.000000e+00> : vector<64x128xf32>
    %43 = tpu.matmul %41, %42, %cst_17 {dimension_numbers = #tpu.dot_dimension_numbers<[1], [0], [0], [1], [0, 0, 1, 1], [], []>} : vector<64x128xbf16>, vector<128x128xbf16>, vector<64x128xf32> -> vector<64x128xf32>
    %44 = arith.addf %39, %43 : vector<64x128xf32>
    %45 = vector.extract_strided_slice %38 {offsets = [0, 0, 1, 0], sizes = [1, 8, 8, 128], strides = [1, 1, 1, 1]} : vector<1x10x10x128xbf16> to vector<1x8x8x128xbf16>
    %46 = vector.shape_cast %45 : vector<1x8x8x128xbf16> to vector<64x128xbf16>
    %c128 = arith.constant 128 : index
    %c0_18 = arith.constant 0 : index
    %47 = vector.load %arg5[%c128, %c0_18] : memref<1152x128xbf16, #tpu.memory_space<vmem>>, vector<128x128xbf16>
    %cst_19 = arith.constant dense<0.000000e+00> : vector<64x128xf32>
    %48 = tpu.matmul %46, %47, %cst_19 {dimension_numbers = #tpu.dot_dimension_numbers<[1], [0], [0], [1], [0, 0, 1, 1], [], []>} : vector<64x128xbf16>, vector<128x128xbf16>, vector<64x128xf32> -> vector<64x128xf32>
    %49 = arith.addf %44, %48 : vector<64x128xf32>
    %50 = vector.extract_strided_slice %38 {offsets = [0, 0, 2, 0], sizes = [1, 8, 8, 128], strides = [1, 1, 1, 1]} : vector<1x10x10x128xbf16> to vector<1x8x8x128xbf16>
    %51 = vector.shape_cast %50 : vector<1x8x8x128xbf16> to vector<64x128xbf16>
    %c256 = arith.constant 256 : index
    %c0_20 = arith.constant 0 : index
    %52 = vector.load %arg5[%c256, %c0_20] : memref<1152x128xbf16, #tpu.memory_space<vmem>>, vector<128x128xbf16>
    %cst_21 = arith.constant dense<0.000000e+00> : vector<64x128xf32>
    %53 = tpu.matmul %51, %52, %cst_21 {dimension_numbers = #tpu.dot_dimension_numbers<[1], [0], [0], [1], [0, 0, 1, 1], [], []>} : vector<64x128xbf16>, vector<128x128xbf16>, vector<64x128xf32> -> vector<64x128xf32>
    %54 = arith.addf %49, %53 : vector<64x128xf32>
    %55 = vector.extract_strided_slice %38 {offsets = [0, 1, 0, 0], sizes = [1, 8, 8, 128], strides = [1, 1, 1, 1]} : vector<1x10x10x128xbf16> to vector<1x8x8x128xbf16>
    %56 = vector.shape_cast %55 : vector<1x8x8x128xbf16> to vector<64x128xbf16>
    %c384 = arith.constant 384 : index
    %c0_22 = arith.constant 0 : index
    %57 = vector.load %arg5[%c384, %c0_22] : memref<1152x128xbf16, #tpu.memory_space<vmem>>, vector<128x128xbf16>
    %cst_23 = arith.constant dense<0.000000e+00> : vector<64x128xf32>
    %58 = tpu.matmul %56, %57, %cst_23 {dimension_numbers = #tpu.dot_dimension_numbers<[1], [0], [0], [1], [0, 0, 1, 1], [], []>} : vector<64x128xbf16>, vector<128x128xbf16>, vector<64x128xf32> -> vector<64x128xf32>
    %59 = arith.addf %54, %58 : vector<64x128xf32>
    %60 = vector.extract_strided_slice %38 {offsets = [0, 1, 1, 0], sizes = [1, 8, 8, 128], strides = [1, 1, 1, 1]} : vector<1x10x10x128xbf16> to vector<1x8x8x128xbf16>
    %61 = vector.shape_cast %60 : vector<1x8x8x128xbf16> to vector<64x128xbf16>
    %c512 = arith.constant 512 : index
    %c0_24 = arith.constant 0 : index
    %62 = vector.load %arg5[%c512, %c0_24] : memref<1152x128xbf16, #tpu.memory_space<vmem>>, vector<128x128xbf16>
    %cst_25 = arith.constant dense<0.000000e+00> : vector<64x128xf32>
    %63 = tpu.matmul %61, %62, %cst_25 {dimension_numbers = #tpu.dot_dimension_numbers<[1], [0], [0], [1], [0, 0, 1, 1], [], []>} : vector<64x128xbf16>, vector<128x128xbf16>, vector<64x128xf32> -> vector<64x128xf32>
    %64 = arith.addf %59, %63 : vector<64x128xf32>
    %65 = vector.extract_strided_slice %38 {offsets = [0, 1, 2, 0], sizes = [1, 8, 8, 128], strides = [1, 1, 1, 1]} : vector<1x10x10x128xbf16> to vector<1x8x8x128xbf16>
    %66 = vector.shape_cast %65 : vector<1x8x8x128xbf16> to vector<64x128xbf16>
    %c640 = arith.constant 640 : index
    %c0_26 = arith.constant 0 : index
    %67 = vector.load %arg5[%c640, %c0_26] : memref<1152x128xbf16, #tpu.memory_space<vmem>>, vector<128x128xbf16>
    %cst_27 = arith.constant dense<0.000000e+00> : vector<64x128xf32>
    %68 = tpu.matmul %66, %67, %cst_27 {dimension_numbers = #tpu.dot_dimension_numbers<[1], [0], [0], [1], [0, 0, 1, 1], [], []>} : vector<64x128xbf16>, vector<128x128xbf16>, vector<64x128xf32> -> vector<64x128xf32>
    %69 = arith.addf %64, %68 : vector<64x128xf32>
    %70 = vector.extract_strided_slice %38 {offsets = [0, 2, 0, 0], sizes = [1, 8, 8, 128], strides = [1, 1, 1, 1]} : vector<1x10x10x128xbf16> to vector<1x8x8x128xbf16>
    %71 = vector.shape_cast %70 : vector<1x8x8x128xbf16> to vector<64x128xbf16>
    %c768 = arith.constant 768 : index
    %c0_28 = arith.constant 0 : index
    %72 = vector.load %arg5[%c768, %c0_28] : memref<1152x128xbf16, #tpu.memory_space<vmem>>, vector<128x128xbf16>
    %cst_29 = arith.constant dense<0.000000e+00> : vector<64x128xf32>
    %73 = tpu.matmul %71, %72, %cst_29 {dimension_numbers = #tpu.dot_dimension_numbers<[1], [0], [0], [1], [0, 0, 1, 1], [], []>} : vector<64x128xbf16>, vector<128x128xbf16>, vector<64x128xf32> -> vector<64x128xf32>
    %74 = arith.addf %69, %73 : vector<64x128xf32>
    %75 = vector.extract_strided_slice %38 {offsets = [0, 2, 1, 0], sizes = [1, 8, 8, 128], strides = [1, 1, 1, 1]} : vector<1x10x10x128xbf16> to vector<1x8x8x128xbf16>
    %76 = vector.shape_cast %75 : vector<1x8x8x128xbf16> to vector<64x128xbf16>
    %c896 = arith.constant 896 : index
    %c0_30 = arith.constant 0 : index
    %77 = vector.load %arg5[%c896, %c0_30] : memref<1152x128xbf16, #tpu.memory_space<vmem>>, vector<128x128xbf16>
    %cst_31 = arith.constant dense<0.000000e+00> : vector<64x128xf32>
    %78 = tpu.matmul %76, %77, %cst_31 {dimension_numbers = #tpu.dot_dimension_numbers<[1], [0], [0], [1], [0, 0, 1, 1], [], []>} : vector<64x128xbf16>, vector<128x128xbf16>, vector<64x128xf32> -> vector<64x128xf32>
    %79 = arith.addf %74, %78 : vector<64x128xf32>
    %80 = vector.extract_strided_slice %38 {offsets = [0, 2, 2, 0], sizes = [1, 8, 8, 128], strides = [1, 1, 1, 1]} : vector<1x10x10x128xbf16> to vector<1x8x8x128xbf16>
    %81 = vector.shape_cast %80 : vector<1x8x8x128xbf16> to vector<64x128xbf16>
    %c1024 = arith.constant 1024 : index
    %c0_32 = arith.constant 0 : index
    %82 = vector.load %arg5[%c1024, %c0_32] : memref<1152x128xbf16, #tpu.memory_space<vmem>>, vector<128x128xbf16>
    %cst_33 = arith.constant dense<0.000000e+00> : vector<64x128xf32>
    %83 = tpu.matmul %81, %82, %cst_33 {dimension_numbers = #tpu.dot_dimension_numbers<[1], [0], [0], [1], [0, 0, 1, 1], [], []>} : vector<64x128xbf16>, vector<128x128xbf16>, vector<64x128xf32> -> vector<64x128xf32>
    %84 = arith.addf %79, %83 : vector<64x128xf32>
    %c0_34 = arith.constant 0 : index
    %c0_35 = arith.constant 0 : index
    %85 = vector.load %arg6[%c0_34, %c0_35] : memref<1x128xf32, #tpu.memory_space<vmem>>, vector<1x128xf32>
    %86 = vector.broadcast %85 : vector<1x128xf32> to vector<64x128xf32>
    %87 = arith.mulf %84, %86 : vector<64x128xf32>
    %c0_36 = arith.constant 0 : index
    %c0_37 = arith.constant 0 : index
    %88 = vector.load %arg7[%c0_36, %c0_37] : memref<1x128xf32, #tpu.memory_space<vmem>>, vector<1x128xf32>
    %89 = vector.broadcast %88 : vector<1x128xf32> to vector<64x128xf32>
    %90 = arith.addf %87, %89 : vector<64x128xf32>
    %cst_38 = arith.constant 0.000000e+00 : f32
    %91 = vector.broadcast %cst_38 : f32 to vector<64x128xf32>
    %92 = arith.maximumf %90, %91 : vector<64x128xf32>
    %c0_39 = arith.constant 0 : index
    %c0_40 = arith.constant 0 : index
    %93 = vector.load %arg8[%c0_39, %c0_40] : memref<64x128xf32, #tpu.memory_space<vmem>>, vector<64x128xf32>
    tpu.vector_store %arg8[%c0_39, %c0_40], %92 {strides = array<i32>} : memref<64x128xf32, #tpu.memory_space<vmem>>, vector<64x128xf32>,
    return
  }
  func.func @transform_0(%arg0: i32) -> (i32, i32, i32, i32) {
    %c0_i32 = arith.constant 0 : i32
    %c0_i32_0 = arith.constant 0 : i32
    %c0_i32_1 = arith.constant 0 : i32
    %c0_i32_2 = arith.constant 0 : i32
    return %arg0, %c0_i32, %c0_i32_0, %c0_i32_1 : i32, i32, i32, i32
  }
  func.func @transform_1(%arg0: i32) -> (i32, i32) {
    %c0_i32 = arith.constant 0 : i32
    %c0_i32_0 = arith.constant 0 : i32
    %c0_i32_1 = arith.constant 0 : i32
    return %c0_i32, %c0_i32_0 : i32, i32
  }
  func.func @transform_2(%arg0: i32) -> (i32, i32) {
    %c0_i32 = arith.constant 0 : i32
    %c0_i32_0 = arith.constant 0 : i32
    %c0_i32_1 = arith.constant 0 : i32
    return %c0_i32, %c0_i32_0 : i32, i32
  }
  func.func @transform_3(%arg0: i32) -> (i32, i32) {
    %c0_i32 = arith.constant 0 : i32
    %c0_i32_0 = arith.constant 0 : i32
    %c0_i32_1 = arith.constant 0 : i32
    return %c0_i32, %c0_i32_0 : i32, i32
  }
  func.func @transform_4(%arg0: i32) -> (i32, i32) {
    %c0_i32 = arith.constant 0 : i32
    %c0_i32_0 = arith.constant 0 : i32
    %c0_i32_1 = arith.constant 0 : i32
    return %c0_i32, %c0_i32_0 : i32, i32
  }
  func.func @transform_5(%arg0: i32) -> (i32, i32) {
    %c0_i32 = arith.constant 0 : i32
    %c0_i32_0 = arith.constant 0 : i32
    %c0_i32_1 = arith.constant 0 : i32
    return %c0_i32, %c0_i32_0 : i32, i32
  }
  func.func @transform_6(%arg0: i32) -> (i32, i32) {
    %c0_i32 = arith.constant 0 : i32
    %c0_i32_0 = arith.constant 0 : i32
    %c0_i32_1 = arith.constant 0 : i32
    return %c0_i32, %c0_i32_0 : i32, i32
  }
  func.func @transform_7(%arg0: i32) -> (i32, i32) {
    %c0_i32 = arith.constant 0 : i32
    %c0_i32_0 = arith.constant 0 : i32
    return %arg0, %c0_i32 : i32, i32
  }
}

</mosaic_0001>

<bundles_post_ra>
// kernel: down_forward.1
= control target key start
LH: loop header
LB: loop body
LE: loop exit
PB: predicated region body
PF: predicated region fallthrough
CT: control target
= control target key end

     0   :  { %s3427_s24 = smov 0   ;;  %s4394_s0 = inlined_call_operand.vmem [shape: bf16[2,8,8,64], index: 0, kind: input, shape index: {}]   ;;  %s4395_s1 = inlined_call_operand.vmem [shape: bf16[144,128], index: 1, kind: input, shape index: {}]   ;;  %s4396_s2 = inlined_call_operand.vmem [shape: f32[1,128], index: 2, kind: input, shape index: {}]   ;;  %s4397_s3 = inlined_call_operand.vmem [shape: f32[1,128], index: 3, kind: input, shape index: {}]   ;;  %s4398_s4 = inlined_call_operand.vmem [shape: bf16[1152,128], index: 4, kind: input, shape index: {}]   ;;  %s4399_s5 = inlined_call_operand.vmem [shape: f32[1,128], index: 5, kind: input, shape index: {}]   ;;  %s4400_s6 = inlined_call_operand.vmem [shape: f32[1,128], index: 6, kind: input, shape index: {}]   ;;  %s4401_s7 = inlined_call_operand.vmem [shape: f32[128,128], index: 7, kind: output, shape index: {}]  }
   0x1 LB: > { %s3433_s25 = sadd.s32 4294967295, %s3377_s24   ;;  %p2711_p0 = scmp.ge.s32.totalorder %s3377_s24, 1  ;;  %s3377_s24 = sphi %s3427_s24, %s17_s24  }
   0x2   : > { %p237_p1 = scmp.lt.s32.totalorder %s3377_s24, 3 }
   0x4   : > { %p238_p2 = pnand %p2711_p0, %p237_p1 }
   0x5   : > { %p269_p3 = scmp.lt.s32.totalorder (!%p238_p2), %s3433_s25, 1  ;;  %vm441_vm0 = vcmask (!%p238_p2), 1040384   ;;  %vm442_vm1 = vsmask.f32 (!%p238_p2), 256  ;;  %v3379_v0 = vmov (!%p238_p2), 0   ;;  %vm453_vm4 = vcmask (!%p238_p2), 1044480  }
   0x6   : > { %241 = sbr.rel (%p238_p2) target bundleno = 1066 (0x42a), region = 48  ;;  %v372_v1 = vrot.slane (!%p238_p2), %v3379_v0, 7  ;;  %vm454_vm2 = vsmask.f32 (!%p238_p2), 4352  ;;  %897 = vmatprep.subr.bf16.mxu0 (!%p238_p2), %v3379_v0  ;;  %vm3441_vm3 = vmand (!%p238_p2), %vm441_vm0, %vm442_vm1  ;;  %s3380_s8 = smov (!%p238_p2), 112   ;;  %vm658_vm6 = vcmask (!%p238_p2), 130048  }
   0x7   : > { %vm3450_vm5 = vmand (!%p238_p2), %vm453_vm4, %vm454_vm2  ;;  %s3381_s9 = smov (!%p238_p2), 16   ;;  %s3382_s10 = smov (!%p238_p2), 96   ;;  %vm675_vm7 = vcmask (!%p238_p2), 261120   ;;  %vm692_vm8 = vcmask (!%p238_p2), 392192   ;;  %vm709_vm9 = vcmask (!%p238_p2), 523264   ;;  %vm726_vm10 = vcmask (!%p238_p2), 654336  }
   0x8   : > { %v444_v3 = vsel (!%p238_p2), %vm3441_vm3, 0, %v372_v1  ;;  %s3383_s11 = smov (!%p238_p2), 32   ;;  %s3384_s12 = smov (!%p238_p2), 48   ;;  %vm743_vm11 = vcmask (!%p238_p2), 785408   ;;  %vm760_vm12 = vcmask (!%p238_p2), 916480   ;;  %vm1540_vm0 = vcmask (!%p238_p2), 1042432  }
   0x9   : > { %v3458_v9 = vsel (!%p238_p2), %vm3450_vm5, %v444_v3, 0  ;;  %s3385_s17 = smov (!%p238_p2), 80   ;;  %vm1159_vm13 = vsmask.f32 (!%p238_p2), 3328  ;;  %vm1160_vm14 = vsmask.f32 (!%p238_p2), 7440 }
   0xa   : > { %v468_v11 = vshll.u32 (!%p238_p2), %v3458_v9, 16  ;;  %v466_v15 = vshrl.u32 (!%p238_p2), %v3458_v9, 16  ;;  %v545_v18 = vrot.slane (!%p238_p2), %v3458_v9, 1  ;;  %vm3905_vm15 = vmor (!%p238_p2), %vm1159_vm13, %vm1160_vm14  ;;  %vm1541_vm1 = vcmask (!%p238_p2), 1046532   ;;  %v3324_v2 = vld [vmem:[%s4398_s4 + $0x160] sm:$0xff] (!%p238_p2)  }
   0xb   : > { %vm3947_vm2 = vmor (!%p238_p2), %vm1540_vm0, %vm1541_vm1 }
   0xc   : > { %v470_v16 = vrot.slane (!%p238_p2), %v468_v11, 1 }
   0xd   : > { %s270_s26 = scalar_select %p269_p3, %s3433_s25, 1 }
   0xe   : > { %v3468_v17 = vor.u32 %v470_v16, %v466_v15 }
   0xf   : > { %s2877_s27 = sshll.u32 %s270_s26, 5 }
  0x10   : > { %s273_s30 = scalar_lea.vmem %s4394_s0, %s2877_s27 }
  0x11   : > { %v281_v5 = vld [vmem:[%s273_s30] sm:$0xf]  ;;  %v283_v6 = vld [vmem:[%s273_s30 + $0x8] sm:$0xf]  ;;  %v282_v7 = vld [vmem:[%s273_s30 + $0x4] sm:$0xf] }
  0x12   : > { %297 = vrot.lane.b32.xlu0 %v281_v5, %s3380_s8  ;;  %301 = vrot.lane.b32.xlu1 %v283_v6, %s3380_s8  ;;  %v284_v8 = vld [vmem:[%s273_s30 + $0xc] sm:$0xf]  ;;  %v285_v10 = vld [vmem:[%s273_s30 + $0x10] sm:$0xf] }
  0x13   : > { %v286_v12 = vld [vmem:[%s273_s30 + $0x14] sm:$0xf]  ;;  %v287_v13 = vld [vmem:[%s273_s30 + $0x18] sm:$0xf]  ;;  %v288_v14 = vld [vmem:[%s273_s30 + $0x1c] sm:$0xf] }
  0x16   : > { %299 = vrot.lane.b32.xlu0 %v282_v7, %s3380_s8  ;;  %303 = vrot.lane.b32.xlu1 %v284_v8, %s3380_s8 }
  0x1a   : > { %305 = vrot.lane.b32.xlu0 %v285_v10, %s3380_s8  ;;  %307 = vrot.lane.b32.xlu1 %v286_v12, %s3380_s8 }
  0x1e   : > { %309 = vrot.lane.b32.xlu0 %v287_v13, %s3380_s8  ;;  %311 = vrot.lane.b32.xlu1 %v288_v14, %s3380_s8 }
  0x22   : > { %521 = vrot.lane.b32.xlu0 %v3468_v17, %s3381_s9  ;;  %640 = vrot.lane.b32.xlu1 %v3458_v9, %s3382_s10 }
  0x26   : > { %553 = vrot.lane.b32.xlu0 %v545_v18, %s3383_s11 }
  0x84   : > { %v298_v19 = vpop.permute.xlu0 %297  ;;  %v302_v20 = vpop.permute.xlu1 %301 }
  0x85   : > { %v321_v21 = vmax.bf16 %v298_v19, %v281_v5  ;;  %v323_v22 = vmax.bf16 %v302_v20, %v283_v6 }
  0x87   : > { %337 = vrot.lane.b32.xlu0 %v321_v21, %s3382_s10 }
  0x88   : > { %v300_v23 = vpop.permute.xlu0 %299  ;;  %v304_v24 = vpop.permute.xlu1 %303 }
  0x89   : > { %v322_v25 = vmax.bf16 %v300_v23, %v282_v7  ;;  %v324_v26 = vmax.bf16 %v304_v24, %v284_v8 }
  0x8b   : > { %341 = vrot.lane.b32.xlu0 %v323_v22, %s3382_s10  ;;  %339 = vrot.lane.b32.xlu1 %v322_v25, %s3382_s10 }
  0x8c   : > { %v306_v27 = vpop.permute.xlu0 %305  ;;  %v308_v28 = vpop.permute.xlu1 %307 }
  0x8d   : > { %v325_v29 = vmax.bf16 %v306_v27, %v285_v10  ;;  %v326_v30 = vmax.bf16 %v308_v28, %v286_v12 }
  0x8f   : > { %343 = vrot.lane.b32.xlu1 %v324_v26, %s3382_s10  ;;  %345 = vrot.lane.b32.xlu0 %v325_v29, %s3382_s10 }
  0x90   : > { %v310_v31 = vpop.permute.xlu0 %309  ;;  %v312_v32 = vpop.permute.xlu1 %311 }
  0x91   : > { %v327_v33 = vmax.bf16 %v310_v31, %v287_v13  ;;  %v328_v34 = vmax.bf16 %v312_v32, %v288_v14 }
  0x93   : > { %347 = vrot.lane.b32.xlu1 %v326_v30, %s3382_s10  ;;  %349 = vrot.lane.b32.xlu0 %v327_v33, %s3382_s10 }
  0x94   : > { %v3486_v35 = vpop.permute.xlu0 %521  ;;  %v3490_v37 = vpop.permute.xlu1 %640 }
  0x97   : > { %351 = vrot.lane.b32.xlu1 %v328_v34, %s3382_s10 }
  0x98   : > { %v3488_v36 = vpop.permute.xlu0 %553 }
  0xf9   : > { %v338_v38 = vpop.permute.xlu0 %337 }
  0xfa   : > { %v361_v39 = vmax.bf16 %v338_v38, %v321_v21 }
  0xfc   : > { %v377_v40 = vshrl.u32 %v361_v39, 16  ;;  %v380_v44 = vshll.u32 %v361_v39, 16 }
  0xfd   : > { %v340_v41 = vpop.permute.xlu1 %339  ;;  %v342_v42 = vpop.permute.xlu0 %341 }
  0xfe   : > { %v379_v43 = vrot.slane %v377_v40, 7  ;;  %v362_v45 = vmax.bf16 %v340_v41, %v322_v25  ;;  %v363_v46 = vmax.bf16 %v342_v42, %v323_v22 }
 0x100   : > { %v382_v47 = vor.u32 %v380_v44, %v379_v43  ;;  %v384_v48 = vshrl.u32 %v362_v45, 16  ;;  %v391_v49 = vshrl.u32 %v363_v46, 16  ;;  %v387_v50 = vshll.u32 %v362_v45, 16 }
 0x101   : > { %v394_v51 = vshll.u32 %v363_v46, 16  ;;  %v344_v52 = vpop.permute.xlu1 %343  ;;  %v346_v53 = vpop.permute.xlu0 %345 }
 0x102   : > { %v445_v54 = vsel %vm3441_vm3, 0, %v382_v47  ;;  %v386_v55 = vrot.slane %v384_v48, 7  ;;  %v393_v56 = vrot.slane %v391_v49, 7  ;;  %v364_v57 = vmax.bf16 %v344_v52, %v324_v26 }
 0x103   : > { %v365_v58 = vmax.bf16 %v346_v53, %v325_v29  ;;  %v3496_v59 = vsel %vm3450_vm5, %v445_v54, 0 }
 0x104   : > { %v389_v60 = vor.u32 %v387_v50, %v386_v55  ;;  %v396_v61 = vor.u32 %v394_v51, %v393_v56  ;;  %v398_v62 = vshrl.u32 %v364_v57, 16  ;;  %570 = vrot.lane.b32.xlu0 %v3496_v59, %s3384_s12  ;;  %v401_v63 = vshll.u32 %v364_v57, 16  ;;  %v3290_v55 = vld [vmem:[%s4395_s1] sm:$0xff]  }
 0x105   : > { %v405_v1 = vshrl.u32 %v365_v58, 16  ;;  %v408_v3 = vshll.u32 %v365_v58, 16  ;;  %v348_v5 = vpop.permute.xlu1 %347  ;;  %v350_v6 = vpop.permute.xlu0 %349  ;;  %898 = vmatpush1.bf16.msra.mxu0 %v3290_v55  ;;  %v546_v57 = vrot.slane %v3496_v59, 1  ;;  %v3291_v58 = vld [vmem:[%s4395_s1 + $0x8] sm:$0xff]  }
 0x106   : > { %v446_v7 = vsel %vm3441_vm3, 0, %v389_v60  ;;  %v447_v8 = vsel %vm3441_vm3, 0, %v396_v61  ;;  %v400_v10 = vrot.slane %v398_v62, 7  ;;  %v366_v11 = vmax.bf16 %v348_v5, %v326_v30  ;;  %899 = vmatprep.subr.bf16.mxu0 %v3379_v0  ;;  %v3292_v60 = vld [vmem:[%s4395_s1 + $0x10] sm:$0xff]   ;;  %v3293_v61 = vld [vmem:[%s4395_s1 + $0x18] sm:$0xff]   ;;  %v3294_v62 = vld [vmem:[%s4395_s1 + $0x20] sm:$0xff]  }
 0x107   : > { %v3506_v12 = vsel %vm3450_vm5, %v446_v7, 0  ;;  %v3510_v13 = vsel %vm3450_vm5, %v447_v8, 0  ;;  %v407_v14 = vrot.slane %v405_v1, 7  ;;  %v367_v15 = vmax.bf16 %v350_v6, %v327_v33  ;;  %v3297_v8 = vld [vmem:[%s4395_s1 + $0x38] sm:$0xff]  }
 0x108   : > { %v403_v16 = vor.u32 %v401_v63, %v400_v10  ;;  %v412_v19 = vshrl.u32 %v366_v11, 16  ;;  %572 = vrot.lane.b32.xlu1 %v3506_v12, %s3384_s12  ;;  %626 = vrot.lane.b32.xlu0 %v3506_v12, %s3382_s10  ;;  %v547_v20 = vrot.slane %v3506_v12, 1  ;;  %v548_v24 = vrot.slane %v3510_v13, 1  ;;  %v3295_v63 = vld [vmem:[%s4395_s1 + $0x28] sm:$0xff]  }
 0x109   : > { %v410_v21 = vor.u32 %v408_v3, %v407_v14  ;;  %v419_v22 = vshrl.u32 %v367_v15, 16  ;;  %v352_v23 = vpop.permute.xlu1 %351  ;;  %v415_v26 = vshll.u32 %v366_v11, 16  ;;  %v422_v28 = vshll.u32 %v367_v15, 16  ;;  %900 = vmatpush1.bf16.msra.mxu0 %v3291_v58  ;;  %v3296_v3 = vld [vmem:[%s4395_s1 + $0x30] sm:$0xff]  }
 0x10a   : > { %v414_v25 = vrot.slane %v412_v19, 7  ;;  %v2717_v29 = vcombine.low %v547_v20, %v548_v24  ;;  %v448_v30 = vsel %vm3441_vm3, 0, %v403_v16  ;;  %v368_v32 = vmax.bf16 %v352_v23, %v328_v34  ;;  %901 = vmatprep.subr.bf16.mxu0 %v3379_v0  ;;  %v3298_v16 = vld [vmem:[%s4395_s1 + $0x40] sm:$0xff]  }
 0x10b   : > { %v421_v27 = vrot.slane %v419_v22, 7  ;;  %v449_v33 = vsel %vm3441_vm3, 0, %v410_v21  ;;  %v3531_v40 = vsel %vm3450_vm5, %v448_v30, 0  ;;  %v475_v1 = vshll.u32 %v3496_v59, 16 }
 0x10c   : > { %v417_v31 = vor.u32 %v415_v26, %v414_v25  ;;  %574 = vrot.lane.b32.xlu0 %v3510_v13, %s3384_s12  ;;  %628 = vrot.lane.b32.xlu1 %v3510_v13, %s3382_s10  ;;  %v3537_v41 = vsel %vm3450_vm5, %v449_v33, 0  ;;  %v426_v44 = vshrl.u32 %v368_v32, 16  ;;  %v3552_v45 = vrot.slane %v3531_v40, 1 }
 0x10d   : > { %v424_v38 = vor.u32 %v422_v28, %v421_v27  ;;  %2733 = vmatprep.mubr.msk.bf16.mxu0 %vm658_vm6, %v2717_v29  ;;  %v3555_v46 = vrot.slane %v3537_v41, 1  ;;  %v429_v50 = vshll.u32 %v368_v32, 16  ;;  %902 = vmatpush1.bf16.msra.mxu0 %v3292_v60  ;;  %v477_v5 = vrot.slane %v475_v1, 1 }
 0x10e   : > { %v450_v39 = vsel %vm3441_vm3, 0, %v417_v31  ;;  %v428_v49 = vrot.slane %v426_v44, 7  ;;  %903 = vmatprep.subr.bf16.mxu0 %v3379_v0  ;;  %v482_v6 = vshll.u32 %v3506_v12, 16  ;;  %v473_v7 = vshrl.u32 %v3496_v59, 16 }
 0x10f   : > { %v451_v34 = vsel %vm3441_vm3, 0, %v424_v38  ;;  %v3541_v42 = vsel %vm3450_vm5, %v450_v39, 0  ;;  %v2719_v51 = vcombine.low %v3552_v45, %v3555_v46  ;;  %v480_v15 = vshrl.u32 %v3506_v12, 16 }
 0x110   : > { %v3545_v43 = vsel %vm3450_vm5, %v451_v34, 0  ;;  %630 = vrot.lane.b32.xlu0 %v3531_v40, %s3382_s10  ;;  %576 = vrot.lane.b32.xlu1 %v3531_v40, %s3384_s12  ;;  %v3558_v47 = vrot.slane %v3541_v42, 1  ;;  %v431_v53 = vor.u32 %v429_v50, %v428_v49  ;;  %v478_v10 = vor.u32 %v477_v5, %v473_v7 }
 0x111   : > { %v3561_v48 = vrot.slane %v3545_v43, 1  ;;  %904 = vmatpush1.bf16.msra.mxu0 %v3293_v61  ;;  %v484_v14 = vrot.slane %v482_v6, 1  ;;  %v496_v21 = vshll.u32 %v3531_v40, 16  ;;  %v487_v22 = vshrl.u32 %v3510_v13, 16 }
 0x112   : > { %v452_v54 = vsel %vm3441_vm3, 0, %v431_v53  ;;  %905 = vmatprep.subr.bf16.mxu0 %v3379_v0  ;;  %v494_v25 = vshrl.u32 %v3531_v40, 16  ;;  %v503_v27 = vshll.u32 %v3537_v41, 16  ;;  %v510_v29 = vshll.u32 %v3541_v42, 16 }
 0x113   : > { %v2721_v52 = vcombine.low %v3558_v47, %v3561_v48  ;;  %v3586_v56 = vsel %vm3450_vm5, %v452_v54, 0  ;;  %v485_v19 = vor.u32 %v484_v14, %v480_v15  ;;  %v501_v30 = vshrl.u32 %v3537_v41, 16 }
 0x114   : > { %578 = vrot.lane.b32.xlu0 %v3537_v41, %s3384_s12  ;;  %632 = vrot.lane.b32.xlu1 %v3537_v41, %s3382_s10  ;;  %v609_v11 = vrot.slane %v3586_v56, 1  ;;  %v505_v28 = vrot.slane %v503_v27, 1  ;;  %v512_v32 = vrot.slane %v510_v29, 1  ;;  %v508_v33 = vshrl.u32 %v3541_v42, 16 }
 0x115   : > { %906 = vmatpush1.bf16.msra.mxu0 %v3294_v62  ;;  %v517_v39 = vshll.u32 %v3545_v43, 16  ;;  %v589_v44 = vshll.u32 %v3586_v56, 16  ;;  %v515_v49 = vshrl.u32 %v3545_v43, 16  ;;  %v587_v54 = vshrl.u32 %v3586_v56, 16 }
 0x116   : > { %907 = vmatprep.subr.bf16.mxu0 %v3379_v0  ;;  %v506_v31 = vor.u32 %v505_v28, %v501_v30  ;;  %v513_v38 = vor.u32 %v512_v32, %v508_v33  ;;  %v660_v30 = vsel %vm658_vm6, %v3458_v9, %v3486_v35 }
 0x117   : > { %v519_v34 = vrot.slane %v517_v39, 1  ;;  %v591_v53 = vrot.slane %v589_v44, 1  ;;  %v677_v33 = vsel %vm675_vm7, %v660_v30, %v3488_v36 }
 0x118   : > { %634 = vrot.lane.b32.xlu0 %v3541_v42, %s3382_s10  ;;  %580 = vrot.lane.b32.xlu1 %v3541_v42, %s3384_s12 }
 0x119   : > { %908 = vmatpush1.bf16.msra.mxu0 %v3295_v63  ;;  %v520_v50 = vor.u32 %v519_v34, %v515_v49  ;;  %v592_v55 = vor.u32 %v591_v53, %v587_v54 }
 0x11a   : > { %909 = vmatprep.subr.bf16.mxu0 %v3379_v0 }
 0x11c   : > { %582 = vrot.lane.b32.xlu0 %v3545_v43, %s3384_s12  ;;  %636 = vrot.lane.b32.xlu1 %v3545_v43, %s3382_s10 }
 0x11d   : > { %910 = vmatpush1.bf16.msra.mxu0 %v3296_v3 }
 0x11e   : > { %911 = vmatprep.subr.bf16.mxu0 %v3379_v0 }
 0x120   : > { %638 = vrot.lane.b32.xlu0 %v3586_v56, %s3382_s10  ;;  %584 = vrot.lane.b32.xlu1 %v3586_v56, %s3384_s12  ;;  %s3386_s12 = smov 64  }
 0x121   : > { %912 = vmatpush1.bf16.msra.mxu0 %v3297_v8 }
 0x122   : > { %913 = vmatprep.subr.bf16.mxu0 %v3379_v0 }
 0x124   : > { %610 = vrot.lane.b32.xlu0 %v546_v57, %s3385_s17  ;;  %555 = vrot.lane.b32.xlu1 %v546_v57, %s3383_s11 }
 0x125   : > { %914 = vmatpush1.bf16.msra.mxu0 %v3298_v16 }
 0x128   : > { %557 = vrot.lane.b32.xlu0 %v547_v20, %s3383_s11  ;;  %612 = vrot.lane.b32.xlu1 %v547_v20, %s3385_s17  ;;  %v489_v20 = vshll.u32 %v3510_v13, 16 }
 0x12a   : > { %v491_v0 = vrot.slane %v489_v20, 1 }
 0x12c   : > { %614 = vrot.lane.b32.xlu0 %v548_v24, %s3385_s17  ;;  %559 = vrot.lane.b32.xlu1 %v548_v24, %s3383_s11  ;;  %v492_v23 = vor.u32 %v491_v0, %v487_v22  ;;  %v498_v24 = vrot.slane %v496_v21, 1 }
 0x12e   : > { %v499_v26 = vor.u32 %v498_v24, %v494_v25 }
 0x130   : > { %561 = vrot.lane.b32.xlu0 %v3552_v45, %s3383_s11  ;;  %616 = vrot.lane.b32.xlu1 %v3552_v45, %s3385_s17 }
 0x134   : > { %618 = vrot.lane.b32.xlu0 %v3555_v46, %s3385_s17  ;;  %563 = vrot.lane.b32.xlu1 %v3555_v46, %s3383_s11 }
 0x138   : > { %565 = vrot.lane.b32.xlu0 %v3558_v47, %s3383_s11  ;;  %620 = vrot.lane.b32.xlu1 %v3558_v47, %s3385_s17 }
 0x13c   : > { %622 = vrot.lane.b32.xlu0 %v3561_v48, %s3385_s17  ;;  %567 = vrot.lane.b32.xlu1 %v3561_v48, %s3383_s11 }
 0x140   : > { %593 = vrot.lane.b32.xlu0 %v478_v10, %s3386_s12  ;;  %624 = vrot.lane.b32.xlu1 %v609_v11, %s3385_s17 }
 0x144   : > { %642 = vrot.lane.b32.xlu0 %v485_v19, %s3380_s8  ;;  %523 = vrot.lane.b32.xlu1 %v478_v10, %s3381_s9 }
 0x148   : > { %525 = vrot.lane.b32.xlu0 %v485_v19, %s3381_s9  ;;  %595 = vrot.lane.b32.xlu1 %v485_v19, %s3386_s12 }
 0x14c   : > { %597 = vrot.lane.b32.xlu0 %v492_v23, %s3386_s12  ;;  %644 = vrot.lane.b32.xlu1 %v492_v23, %s3380_s8 }
 0x150   : > { %646 = vrot.lane.b32.xlu0 %v499_v26, %s3380_s8  ;;  %527 = vrot.lane.b32.xlu1 %v492_v23, %s3381_s9 }
 0x154   : > { %529 = vrot.lane.b32.xlu0 %v499_v26, %s3381_s9  ;;  %599 = vrot.lane.b32.xlu1 %v499_v26, %s3386_s12 }
 0x158   : > { %601 = vrot.lane.b32.xlu0 %v506_v31, %s3386_s12  ;;  %648 = vrot.lane.b32.xlu1 %v506_v31, %s3380_s8 }
 0x15c   : > { %650 = vrot.lane.b32.xlu0 %v513_v38, %s3380_s8  ;;  %531 = vrot.lane.b32.xlu1 %v506_v31, %s3381_s9 }
 0x160   : > { %533 = vrot.lane.b32.xlu0 %v513_v38, %s3381_s9  ;;  %603 = vrot.lane.b32.xlu1 %v513_v38, %s3386_s12 }
 0x164   : > { %605 = vrot.lane.b32.xlu0 %v520_v50, %s3386_s12  ;;  %652 = vrot.lane.b32.xlu1 %v520_v50, %s3380_s8 }
 0x168   : > { %654 = vrot.lane.b32.xlu0 %v592_v55, %s3380_s8  ;;  %535 = vrot.lane.b32.xlu1 %v520_v50, %s3381_s9  ;;  %s2714_s9 = sshll.u32 %s3433_s25, 3 }
 0x169   : > { %p275_p4 = scmp.lt.s32.totalorder %s2714_s9, 15 }
 0x16b   : > { %s4411_s9 = smov (!%p275_p4, %s2714_s9), 15 }
 0x16c   : > { %607 = vrot.lane.b32.xlu1 %v592_v55, %s3386_s12  ;;  %s2715_s18 = sshll.u32 %s4411_s9, 3 }
 0x16d   : > { %s4381_s20 = scalar_lea.vmem %s4401_s7, %s2715_s18 }
 0x170   : > { %656 = vrot.lane.b32.xlu1 %v3468_v17, %s3380_s8 }
 0x176   : > { %v571_v57 = vpop.permute.xlu0 %570 }
 0x177   : > { %v694_v38 = vsel %vm692_vm8, %v677_v33, %v571_v57 }
 0x17a   : > { %v573_v58 = vpop.permute.xlu1 %572  ;;  %v627_v60 = vpop.permute.xlu0 %626 }
 0x17e   : > { %v629_v61 = vpop.permute.xlu1 %628  ;;  %v575_v62 = vpop.permute.xlu0 %574 }
 0x182   : > { %v3691_v63 = vpop.permute.xlu1 %576  ;;  %v3693_v1 = vpop.permute.xlu0 %630 }
 0x186   : > { %v3695_v3 = vpop.permute.xlu1 %632  ;;  %v3697_v5 = vpop.permute.xlu0 %578 }
 0x18a   : > { %v3699_v6 = vpop.permute.xlu1 %580  ;;  %v3701_v7 = vpop.permute.xlu0 %634 }
 0x18e   : > { %v3703_v8 = vpop.permute.xlu1 %636  ;;  %v3705_v17 = vpop.permute.xlu0 %582 }
 0x192   : > { %v3707_v10 = vpop.permute.xlu1 %584  ;;  %v3709_v14 = vpop.permute.xlu0 %638 }
 0x196   : > { %v556_v15 = vpop.permute.xlu1 %555  ;;  %v611_v16 = vpop.permute.xlu0 %610 }
 0x19a   : > { %v613_v19 = vpop.permute.xlu1 %612  ;;  %v558_v20 = vpop.permute.xlu0 %557 }
 0x19e   : > { %v560_v0 = vpop.permute.xlu1 %559  ;;  %v615_v21 = vpop.permute.xlu0 %614 }
 0x1a2   : > { %v617_v22 = vpop.permute.xlu1 %616  ;;  %v562_v23 = vpop.permute.xlu0 %561 }
 0x1a6   : > { %v3711_v24 = vpop.permute.xlu1 %563  ;;  %v619_v25 = vpop.permute.xlu0 %618 }
 0x1aa   : > { %v3713_v26 = vpop.permute.xlu1 %620  ;;  %v3715_v27 = vpop.permute.xlu0 %565 }
 0x1ae   : > { %v3717_v28 = vpop.permute.xlu1 %567  ;;  %v3719_v29 = vpop.permute.xlu0 %622 }
 0x1b2   : > { %v3724_v31 = vpop.permute.xlu1 %624  ;;  %v594_v32 = vpop.permute.xlu0 %593 }
 0x1b3   : > { %v711_v39 = vsel %vm709_vm9, %v694_v38, %v594_v32 }
 0x1b4   : > { %v728_v50 = vsel %vm726_vm10, %v711_v39, %v611_v16 }
 0x1b5   : > { %v745_v30 = vsel %vm743_vm11, %v728_v50, %v627_v60 }
 0x1b6   : > { %v524_v34 = vpop.permute.xlu1 %523  ;;  %v643_v44 = vpop.permute.xlu0 %642 }
 0x1b7   : > { %v662_v49 = vsel %vm658_vm6, %v3496_v59, %v524_v34 }
 0x1b8   : > { %v679_v35 = vsel %vm675_vm7, %v662_v49, %v556_v15 }
 0x1b9   : > { %v696_v53 = vsel %vm692_vm8, %v679_v35, %v573_v58  ;;  %v762_v58 = vsel %vm760_vm12, %v745_v30, %v643_v44 }
 0x1ba   : > { %v596_v54 = vpop.permute.xlu1 %595  ;;  %v526_v55 = vpop.permute.xlu0 %525 }
 0x1bb   : > { %v713_v36 = vsel %vm709_vm9, %v696_v53, %v596_v54  ;;  %v664_v57 = vsel %vm658_vm6, %v3506_v12, %v526_v55 }
 0x1bc   : > { %v730_v32 = vsel %vm726_vm10, %v713_v36, %v613_v19  ;;  %v681_v59 = vsel %vm675_vm7, %v664_v57, %v558_v20 }
 0x1bd   : > { %v747_v15 = vsel %vm743_vm11, %v730_v32, %v629_v61  ;;  %v698_v39 = vsel %vm692_vm8, %v681_v59, %v575_v62 }
 0x1be   : > { %v645_v16 = vpop.permute.xlu1 %644  ;;  %v598_v33 = vpop.permute.xlu0 %597 }
 0x1bf   : > { %v764_v38 = vsel %vm760_vm12, %v747_v15, %v645_v16  ;;  %v715_v12 = vsel %vm709_vm9, %v698_v39, %v598_v33 }
 0x1c0   : > { %v2716_v34 = vcombine.low %v762_v58, %v764_v38  ;;  %v732_v20 = vsel %vm726_vm10, %v715_v12, %v615_v21 }
 0x1c2   : > { %v528_v49 = vpop.permute.xlu1 %527  ;;  %930 = vmatmul.mubr.bf16.vlgmr.msra.gmra.mrb[0].mxu0 %v2716_v34  ;;  %v647_v60 = vpop.permute.xlu0 %646 }
 0x1c3   : > { %v666_v19 = vsel %vm658_vm6, %v3510_v13, %v528_v49  ;;  %2734 = vmatprep.mubr.msk.bf16.mxu0 %vm658_vm6, %v2719_v51  ;;  %v749_v13 = vsel %vm743_vm11, %v732_v20, %v3693_v1  ;;  %v3306_v20 = vld [vmem:[%s4398_s4 + $0x118] sm:$0xff]  }
 0x1c4   : > { %v683_v61 = vsel %vm675_vm7, %v666_v19, %v560_v0  ;;  %v766_v54 = vsel %vm760_vm12, %v749_v13, %v647_v60  ;;  %v3303_v60 = vld [vmem:[%s4398_s4 + $0x50] sm:$0xff]  }
 0x1c5   : > { %v700_v62 = vsel %vm692_vm8, %v683_v61, %v3691_v63  ;;  %v3304_v19 = vld [vmem:[%s4398_s4 + $0x110] sm:$0xff]   ;;  %v3305_v61 = vld [vmem:[%s4398_s4 + $0x58] sm:$0xff]  }
 0x1c6   : > { %v600_v44 = vpop.permute.xlu1 %599  ;;  %v530_v35 = vpop.permute.xlu0 %529  ;;  %v3312_v13 = vld [vmem:[%s4398_s4 + $0x130] sm:$0xff]  }
 0x1c7   : > { %v717_v50 = vsel %vm709_vm9, %v700_v62, %v600_v44  ;;  %v668_v53 = vsel %vm658_vm6, %v3531_v40, %v530_v35  ;;  %v3307_v62 = vld [vmem:[%s4398_s4 + $0x60] sm:$0xff]   ;;  %v3309_v35 = vld [vmem:[%s4398_s4 + $0x68] sm:$0xff]  }
 0x1c8   : > { %v734_v45 = vsel %vm726_vm10, %v717_v50, %v617_v22  ;;  %v685_v46 = vsel %vm675_vm7, %v668_v53, %v562_v23  ;;  %v3308_v44 = vld [vmem:[%s4398_s4 + $0x120] sm:$0xff]   ;;  %v3310_v50 = vld [vmem:[%s4398_s4 + $0x128] sm:$0xff]   ;;  %v3311_v53 = vld [vmem:[%s4398_s4 + $0x70] sm:$0xff]  }
 0x1c9   : > { %v751_v51 = vsel %vm743_vm11, %v734_v45, %v3695_v3  ;;  %v702_v63 = vsel %vm692_vm8, %v685_v46, %v3697_v5  ;;  %v3313_v45 = vld [vmem:[%s4398_s4 + $0x78] sm:$0xff]  }
 0x1ca   : > { %v649_v0 = vpop.permute.xlu1 %648  ;;  %v602_v21 = vpop.permute.xlu0 %601  ;;  %v3314_v46 = vld [vmem:[%s4398_s4 + $0x138] sm:$0xff]  }
 0x1cb   : > { %v768_v55 = vsel %vm760_vm12, %v751_v51, %v649_v0  ;;  %v719_v40 = vsel %vm709_vm9, %v702_v63, %v602_v21  ;;  %v3870_v51 = vld [vmem:[%s4398_s4] sm:$0xff]   ;;  %v3881_v0 = vcombine.low %v3458_v9, %v3458_v9 }
 0x1cc   : > { %v2718_v36 = vcombine.low %v766_v54, %v768_v55  ;;  %v736_v1 = vsel %vm726_vm10, %v719_v40, %v619_v25  ;;  %v3876_v63 = vld [vmem:[%s4398_s4 + $0x140] sm:$0xff]  }
 0x1cd   : > { %v753_v22 = vsel %vm743_vm11, %v736_v1, %v3701_v7  ;;  %v3886_v21 = vld [vmem:[%s4396_s2] ss:$0 sm:$0xff]  ;;  %v1163_v40 = vshrl.u32 %v3881_v0, 16 }
 0x1ce   : > { %v532_v23 = vpop.permute.xlu1 %531  ;;  %938 = vmatmul.mubr.bf16.gmra.mrb[4].mxu0 %v2718_v36  ;;  %v651_v3 = vpop.permute.xlu0 %650  ;;  %v3891_v55 = vld [vmem:[%s4397_s3] ss:$0 sm:$0xff]  ;;  %v1166_v36 = vshll.u32 %v3881_v0, 16 }
 0x1cf   : > { %v670_v5 = vsel %vm658_vm6, %v3537_v41, %v532_v23  ;;  %2735 = vmatprep.mubr.msk.bf16.mxu0 %vm658_vm6, %v2721_v52 }
 0x1d0   : > { %v687_v57 = vsel %vm675_vm7, %v670_v5, %v3711_v24  ;;  %v770_v24 = vsel %vm760_vm12, %v753_v22, %v651_v3 }
 0x1d1   : > { %v704_v25 = vsel %vm692_vm8, %v687_v57, %v3699_v6 }
 0x1d2   : > { %v604_v30 = vpop.permute.xlu1 %603  ;;  %v534_v32 = vpop.permute.xlu0 %533 }
 0x1d3   : > { %v721_v7 = vsel %vm709_vm9, %v704_v25, %v604_v30  ;;  %v672_v59 = vsel %vm658_vm6, %v3541_v42, %v534_v32  ;;  %v2723_v42 = vcombine.low %v609_v11, %v545_v18  ;;  %v1165_v25 = vrot.slane %v1163_v40, 4 }
 0x1d4   : > { %v738_v41 = vsel %vm726_vm10, %v721_v7, %v3713_v26  ;;  %v689_v47 = vsel %vm675_vm7, %v672_v59, %v3715_v27  ;;  %v1168_v30 = vrot.slane %v1166_v36, 5  ;;  %v3901_v59 = vcombine.high %v3458_v9, %v3458_v9 }
 0x1d5   : > { %v755_v48 = vsel %vm743_vm11, %v738_v41, %v3703_v8  ;;  %v706_v15 = vsel %vm692_vm8, %v689_v47, %v3705_v17 }
 0x1d6   : > { %v653_v52 = vpop.permute.xlu1 %652  ;;  %v606_v16 = vpop.permute.xlu0 %605 }
 0x1d7   : > { %v772_v6 = vsel %vm760_vm12, %v755_v48, %v653_v52  ;;  %v723_v26 = vsel %vm709_vm9, %v706_v15, %v606_v16  ;;  %v1169_v48 = vor.u32 %v1168_v30, %v1165_v25  ;;  %v1172_v52 = vshll.u32 %v3901_v59, 16 }
 0x1d8   : > { %v2720_v33 = vcombine.low %v770_v24, %v772_v6  ;;  %v740_v17 = vsel %vm726_vm10, %v723_v26, %v3719_v29 }
 0x1d9   : > { %v757_v11 = vsel %vm743_vm11, %v740_v17, %v3709_v14  ;;  %v3300_v14 = vld [vmem:[%s4398_s4 + $0x100] sm:$0xff]   ;;  %v1170_v26 = vrot.slane %v1169_v48, 4 }
 0x1da   : > { %v536_v27 = vpop.permute.xlu1 %535  ;;  %946 = vmatmul.mubr.bf16.gmra.mrb[8].mxu0 %v2720_v33  ;;  %v655_v39 = vpop.permute.xlu0 %654  ;;  %3090 = vmatprep.subr.bf16.mxu1 %v3300_v14 }
 0x1db   : > { %v674_v8 = vsel %vm658_vm6, %v3545_v43, %v536_v27  ;;  %2736 = vmatprep.mubr.msk.bf16.mxu0 %vm658_vm6, %v2723_v42  ;;  %v774_v12 = vsel %vm760_vm12, %v757_v11, %v655_v39  ;;  %3091 = vmatpush3.bf16.msra.mxu1 %v3300_v14  ;;  %v1174_v27 = vrot.slane %v1172_v52, 5 }
 0x1dc   : > { %v691_v58 = vsel %vm675_vm7, %v674_v8, %v3717_v28 }
 0x1dd   : > { %v708_v38 = vsel %vm692_vm8, %v691_v58, %v3707_v10  ;;  %v3299_v10 = vld [vmem:[%s4398_s4 + $0x40] sm:$0xff]  }
 0x1de   : > { %v608_v56 = vpop.permute.xlu1 %607  ;;  %2994 = vmatprep.subr.bf16.mxu0 %v3299_v10 }
 0x1df   : > { %v725_v18 = vsel %vm709_vm9, %v708_v38, %v608_v56  ;;  %2995 = vmatpush3.bf16.msra.mxu0 %v3299_v10 }
 0x1e0   : > { %v742_v43 = vsel %vm726_vm10, %v725_v18, %v3724_v31  ;;  %v3302_v31 = vld [vmem:[%s4398_s4 + $0x108] sm:$0xff]   ;;  %v3331_v18 = vld [vmem:[%s4398_s4 + $0x80] sm:$0xff]  }
 0x1e1   : > { %v759_v34 = vsel %vm743_vm11, %v742_v43, %v3490_v37  ;;  %v3301_v37 = vld [vmem:[%s4398_s4 + $0x48] sm:$0xff]   ;;  %3092 = vmatprep.subr.bf16.mxu1 %v3302_v31 }
 0x1e2   : > { %v657_v28 = vpop.permute.xlu1 %656  ;;  %2996 = vmatprep.subr.bf16.mxu0 %v3301_v37  ;;  %3093 = vmatpush3.bf16.msra.mxu1 %v3302_v31 }
 0x1e3   : > { %v776_v29 = vsel %vm760_vm12, %v759_v34, %v657_v28  ;;  %2997 = vmatpush3.bf16.msra.mxu0 %v3301_v37  ;;  %3094 = vmatprep.subr.bf16.mxu1 %v3304_v19 }
 0x1e4   : > { %v2722_v49 = vcombine.low %v774_v12, %v776_v29  ;;  %2998 = vmatprep.subr.bf16.mxu0 %v3303_v60 }
 0x1e6   : > { %954 = vmatmul.mubr.bf16.gmra.mrb[12].mxu0 %v2722_v49  ;;  %3095 = vmatpush3.bf16.msra.mxu1 %v3304_v19  ;;  %v3919_v49 = vsel %vm3905_vm15, %v1170_v26, %v1174_v27 }
 0x1e7   : > { %2999 = vmatpush3.bf16.msra.mxu0 %v3303_v60  ;;  %3096 = vmatprep.subr.bf16.mxu1 %v3306_v20 }
 0x1e8   : > { %3000 = vmatprep.subr.bf16.mxu0 %v3305_v61 }
 0x1ea   : > { %3097 = vmatpush3.bf16.msra.mxu1 %v3306_v20  ;;  %v1545_v20 = vrot.slane %v3901_v59, 5 }
 0x1eb   : > { %3001 = vmatpush3.bf16.msra.mxu0 %v3305_v61  ;;  %3098 = vmatprep.subr.bf16.mxu1 %v3308_v44  ;;  %v2787_v61 = vrot.slane %v3881_v0, 9 }
 0x1ec   : > { %3002 = vmatprep.subr.bf16.mxu0 %v3307_v62 }
 0x1ee   : > { %3099 = vmatpush3.bf16.msra.mxu1 %v3308_v44 }
 0x1ef   : > { %3003 = vmatpush3.bf16.msra.mxu0 %v3307_v62  ;;  %3100 = vmatprep.subr.bf16.mxu1 %v3310_v50 }
 0x1f0   : > { %3004 = vmatprep.subr.bf16.mxu0 %v3309_v35 }
 0x1f2   : > { %3101 = vmatpush3.bf16.msra.mxu1 %v3310_v50 }
 0x1f3   : > { %3005 = vmatpush3.bf16.msra.mxu0 %v3309_v35  ;;  %3102 = vmatprep.subr.bf16.mxu1 %v3312_v13 }
 0x1f4   : > { %3006 = vmatprep.subr.bf16.mxu0 %v3311_v53 }
 0x1f6   : > { %3103 = vmatpush3.bf16.msra.mxu1 %v3312_v13 }
 0x1f7   : > { %3007 = vmatpush3.bf16.msra.mxu0 %v3311_v53  ;;  %3104 = vmatprep.subr.bf16.mxu1 %v3314_v46 }
 0x1f8   : > { %3008 = vmatprep.subr.bf16.mxu0 %v3313_v45 }
 0x1fa   : > { %3105 = vmatpush3.bf16.msra.mxu1 %v3314_v46 }
 0x1fb   : > { %3009 = vmatpush3.bf16.msra.mxu0 %v3313_v45  ;;  %3114 = vmatprep.subr.bf16.mxu1 %v3876_v63 }
 0x1fc   : > { %3018 = vmatprep.subr.bf16.mxu0 %v3870_v51 }
 0x295   : > { %v931_v54 = vpop.f32.mrb[0].mxu0 }
 0x296   : > { %v969_v1 = vmul.f32 %v3886_v21, %v931_v54  ;;  %v933_v22 = vpop.f32.mrb[1].mxu0 }
 0x297   : > { %v934_v23 = vpop.f32.mrb[2].mxu0 }
 0x298   : > { %v984_v3 = vadd.f32 %v3891_v55, %v969_v1  ;;  %v970_v5 = vmul.f32 %v3886_v21, %v934_v23  ;;  %v936_v57 = vpop.f32.mrb[3].mxu0 }
 0x29a   : > { %v992_v32 = vmax.f32 %v984_v3, 0.0  ;;  %v985_v7 = vadd.f32 %v3891_v55, %v970_v5 }
 0x29c   : > { %v2878_v41 = vpack.c.bf16 %v992_v32, %v992_v32  ;;  %v993_v47 = vmax.f32 %v985_v7, 0.0 }
 0x29e   : > { %v1025_v24 = vshrl.u32 %v2878_v41, 16  ;;  %v2879_v6 = vpack.c.bf16 %v993_v47, %v993_v47  ;;  %v1028_v16 = vshll.u32 %v2878_v41, 16 }
 0x2a0   : > { %v1027_v15 = vrot.slane %v1025_v24, 7  ;;  %v1032_v33 = vshrl.u32 %v2879_v6, 16  ;;  %v1035_v17 = vshll.u32 %v2879_v6, 16 }
 0x2a1   : > { %v939_v42 = vpop.f32.mrb[4].mxu0 }
 0x2a2   : > { %v1030_v8 = vor.u32 %v1028_v16, %v1027_v15  ;;  %v1034_v58 = vrot.slane %v1032_v33, 7  ;;  %v971_v38 = vmul.f32 %v3886_v21, %v939_v42  ;;  %v941_v56 = vpop.f32.mrb[5].mxu0 }
 0x2a3   : > { %v942_v11 = vpop.f32.mrb[6].mxu0 }
 0x2a4   : > { %v1088_v39 = vsel %vm3441_vm3, 0, %v1030_v8  ;;  %v1037_v43 = vor.u32 %v1035_v17, %v1034_v58  ;;  %v986_v34 = vadd.f32 %v3891_v55, %v971_v38  ;;  %v972_v28 = vmul.f32 %v3886_v21, %v942_v11  ;;  %v944_v12 = vpop.f32.mrb[7].mxu0 }
 0x2a5   : > { %v3915_v29 = vsel %vm3450_vm5, %v1088_v39, 0 }
 0x2a6   : > { %v2749_v10 = vcombine.low %v3915_v29, %v3915_v29  ;;  %v1089_v14 = vsel %vm3441_vm3, 0, %v1037_v43  ;;  %v994_v37 = vmax.f32 %v986_v34, 0.0  ;;  %v987_v31 = vadd.f32 %v3891_v55, %v972_v28 }
 0x2a7   : > { %v3928_v60 = vsel %vm3450_vm5, %v1089_v14, 0  ;;  %v2750_v19 = vcombine.high %v3915_v29, %v3915_v29  ;;  %v2775_v0 = vcombine.low %v3458_v9, %v3915_v29 }
 0x2a8   : > { %v2880_v62 = vpack.c.bf16 %v994_v37, %v994_v37  ;;  %v995_v44 = vmax.f32 %v987_v31, 0.0  ;;  %v1177_v35 = vshrl.u32 %v2749_v10, 16  ;;  %v1180_v50 = vshll.u32 %v2749_v10, 16 }
 0x2a9   : > { %v1186_v53 = vshll.u32 %v2750_v19, 16  ;;  %v3936_v13 = vcombine.low %v3928_v60, %v3928_v60  ;;  %v3940_v45 = vcombine.high %v3928_v60, %v3928_v60  ;;  %v2788_v46 = vrot.slane %v2749_v10, 9 }
 0x2aa   : > { %v1039_v54 = vshrl.u32 %v2880_v62, 16  ;;  %v1042_v40 = vshll.u32 %v2880_v62, 16  ;;  %v2881_v36 = vpack.c.bf16 %v995_v44, %v995_v44  ;;  %v1179_v1 = vrot.slane %v1177_v35, 4 }
 0x2ab   : > { %v1182_v22 = vrot.slane %v1180_v50, 5  ;;  %v1188_v23 = vrot.slane %v1186_v53, 5  ;;  %v1191_v3 = vshrl.u32 %v3936_v13, 16  ;;  %v1194_v5 = vshll.u32 %v3936_v13, 16 }
 0x2ac   : > { %v1041_v57 = vrot.slane %v1039_v54, 7  ;;  %v1046_v25 = vshrl.u32 %v2881_v36, 16  ;;  %v1049_v30 = vshll.u32 %v2881_v36, 16  ;;  %v1200_v32 = vshll.u32 %v3940_v45, 16 }
 0x2ad   : > { %v947_v41 = vpop.f32.mrb[8].mxu0  ;;  %v1183_v47 = vor.u32 %v1182_v22, %v1179_v1  ;;  %v1193_v48 = vrot.slane %v1191_v3, 4  ;;  %v1196_v52 = vrot.slane %v1194_v5, 5  ;;  %v1549_v24 = vrot.slane %v2750_v19, 5 }
 0x2ae   : > { %v1044_v6 = vor.u32 %v1042_v40, %v1041_v57  ;;  %v1048_v15 = vrot.slane %v1046_v25, 7  ;;  %v973_v16 = vmul.f32 %v3886_v21, %v947_v41  ;;  %v949_v33 = vpop.f32.mrb[9].mxu0  ;;  %v1202_v42 = vrot.slane %v1200_v32, 5 }
 0x2af   : > { %v950_v26 = vpop.f32.mrb[10].mxu0  ;;  %v1184_v27 = vrot.slane %v1183_v47, 4  ;;  %v1197_v8 = vor.u32 %v1196_v52, %v1193_v48  ;;  %v3954_v58 = vsel %vm3947_vm2, %v2788_v46, %v1549_v24  ;;  %v2789_v17 = vrot.slane %v3936_v13, 9 }
 0x2b0   : > { %v1090_v38 = vsel %vm3441_vm3, 0, %v1044_v6  ;;  %v1051_v56 = vor.u32 %v1049_v30, %v1048_v15  ;;  %v988_v11 = vadd.f32 %v3891_v55, %v973_v16  ;;  %v974_v39 = vmul.f32 %v3886_v21, %v950_v26  ;;  %v952_v43 = vpop.f32.mrb[11].mxu0 }
 0x2b1   : > { %v3963_v34 = vsel %vm3450_vm5, %v1090_v38, 0  ;;  %v1189_v28 = vsel %vm3905_vm15, %v1184_v27, %v1188_v23  ;;  %v1198_v12 = vrot.slane %v1197_v8, 4  ;;  %v1553_v10 = vrot.slane %v3940_v45, 5 }
 0x2b2   : > { %v2753_v14 = vcombine.low %v3963_v34, %v3963_v34  ;;  %v1091_v37 = vsel %vm3441_vm3, 0, %v1051_v56  ;;  %v996_v31 = vmax.f32 %v988_v11, 0.0  ;;  %v989_v19 = vadd.f32 %v3891_v55, %v974_v39 }
 0x2b3   : > { %v3975_v62 = vsel %vm3450_vm5, %v1091_v37, 0  ;;  %v2763_v44 = vcombine.low %v3919_v49, %v1189_v28  ;;  %v2754_v35 = vcombine.high %v3963_v34, %v3963_v34  ;;  %v1203_v50 = vsel %vm3905_vm15, %v1198_v12, %v1202_v42 }
 0x2b4   : > { %v3984_v53 = vcombine.low %v3975_v62, %v3975_v62  ;;  %v2882_v13 = vpack.c.bf16 %v996_v31, %v996_v31  ;;  %v997_v45 = vmax.f32 %v989_v19, 0.0  ;;  %v1205_v46 = vshrl.u32 %v2753_v14, 16 }
 0x2b5   : > { %3010 = vmatprep.mubr.bf16.mxu0 %v2763_v44  ;;  %v1208_v54 = vshll.u32 %v2753_v14, 16  ;;  %v1214_v40 = vshll.u32 %v2754_v35, 16  ;;  %v2821_v36 = vcombine.low %v1189_v28, %v1203_v50  ;;  %v3988_v1 = vcombine.high %v3975_v62, %v3975_v62 }
 0x2b6   : > { %v1053_v22 = vshrl.u32 %v2882_v13, 16  ;;  %v1056_v23 = vshll.u32 %v2882_v13, 16  ;;  %v2883_v3 = vpack.c.bf16 %v997_v45, %v997_v45  ;;  %v1207_v5 = vrot.slane %v1205_v46, 4 }
 0x2b7   : > { %v1210_v57 = vrot.slane %v1208_v54, 5  ;;  %v1216_v25 = vrot.slane %v1214_v40, 5  ;;  %3106 = vmatprep.mubr.bf16.mxu1 %v2821_v36  ;;  %v1219_v30 = vshrl.u32 %v3984_v53, 16  ;;  %v1222_v32 = vshll.u32 %v3984_v53, 16  ;;  %v3317_v54 = vld [vmem:[%s4398_s4 + $0x8] sm:$0xff]  }
 0x2b8   : > { %v1055_v41 = vrot.slane %v1053_v22, 7  ;;  %v1060_v47 = vshrl.u32 %v2883_v3, 16  ;;  %v1063_v48 = vshll.u32 %v2883_v3, 16  ;;  %v1228_v52 = vshll.u32 %v3988_v1, 16 }
 0x2b9   : > { %v1211_v24 = vor.u32 %v1210_v57, %v1207_v5  ;;  %v955_v6 = vpop.f32.mrb[12].mxu0  ;;  %v1221_v15 = vrot.slane %v1219_v30, 4  ;;  %v1224_v16 = vrot.slane %v1222_v32, 5  ;;  %v3995_v33 = vsel %vm3947_vm2, %v2789_v17, %v1553_v10  ;;  %v3318_v57 = vld [vmem:[%s4398_s4 + $0x148] sm:$0xff]  }
 0x2ba   : > { %v1058_v42 = vor.u32 %v1056_v23, %v1055_v41  ;;  %v1062_v26 = vrot.slane %v1060_v47, 7  ;;  %v975_v27 = vmul.f32 %v3886_v21, %v955_v6  ;;  %v957_v8 = vpop.f32.mrb[13].mxu0  ;;  %v1230_v38 = vrot.slane %v1228_v52, 5  ;;  %v3319_v52 = vld [vmem:[%s4398_s4 + $0x10] sm:$0xff]  }
 0x2bb   : > { %v1212_v56 = vrot.slane %v1211_v24, 4  ;;  %v958_v11 = vpop.f32.mrb[14].mxu0  ;;  %v1225_v39 = vor.u32 %v1224_v16, %v1221_v15  ;;  %v2790_v43 = vrot.slane %v2753_v14, 9  ;;  %v1557_v28 = vrot.slane %v2754_v35, 5 }
 0x2bc   : > { %v1092_v12 = vsel %vm3441_vm3, 0, %v1058_v42  ;;  %v1065_v37 = vor.u32 %v1063_v48, %v1062_v26  ;;  %v990_v31 = vadd.f32 %v3891_v55, %v975_v27  ;;  %v976_v17 = vmul.f32 %v3886_v21, %v958_v11  ;;  %v960_v10 = vpop.f32.mrb[15].mxu0  ;;  %v3320_v27 = vld [vmem:[%s4398_s4 + $0x150] sm:$0xff]  }
 0x2bd   : > { %v4004_v19 = vsel %vm3450_vm5, %v1092_v12, 0  ;;  %v1217_v44 = vsel %vm3905_vm15, %v1212_v56, %v1216_v25  ;;  %v1226_v13 = vrot.slane %v1225_v39, 4  ;;  %v4010_v14 = vsel %vm3947_vm2, %v2790_v43, %v1557_v28  ;;  %v3321_v12 = vld [vmem:[%s4398_s4 + $0x18] sm:$0xff]  }
 0x2be   : > { %v4014_v35 = vcombine.low %v4004_v19, %v4004_v19  ;;  %v1093_v21 = vsel %vm3441_vm3, 0, %v1065_v37  ;;  %v4018_v45 = vcombine.low %v1203_v50, %v1217_v44  ;;  %v998_v46 = vmax.f32 %v990_v31, 0.0 }
 0x2bf   : > { %v4025_v40 = vsel %vm3450_vm5, %v1093_v21, 0  ;;  %v991_v36 = vadd.f32 %v3891_v55, %v976_v17  ;;  %v1231_v22 = vsel %vm3905_vm15, %v1226_v13, %v1230_v38  ;;  %v4032_v23 = vcombine.high %v4004_v19, %v4004_v19 }
 0x2c0   : > { %v4036_v50 = vcombine.low %v4025_v40, %v4025_v40  ;;  %v2884_v3 = vpack.c.bf16 %v998_v46, %v998_v46  ;;  %3011 = vmatmul.mubr.bf16.vlgmr.msra.gmra.mrb[16].mxu0 %v4018_v45  ;;  %v2822_v5 = vcombine.low %v1217_v44, %v1231_v22  ;;  %v1233_v55 = vshrl.u32 %v4014_v35, 16  ;;  %v3322_v46 = vld [vmem:[%s4398_s4 + $0x158] sm:$0xff]  }
 0x2c1   : > { %v999_v25 = vmax.f32 %v991_v36, 0.0  ;;  %3019 = vmatpush3.bf16.msra.mxu0 %v3870_v51  ;;  %v1236_v30 = vshll.u32 %v4014_v35, 16  ;;  %v1242_v32 = vshll.u32 %v4032_v23, 16  ;;  %v4048_v41 = vcombine.high %v4025_v40, %v4025_v40 }
 0x2c2   : > { %v1067_v47 = vshrl.u32 %v2884_v3, 16  ;;  %v1070_v48 = vshll.u32 %v2884_v3, 16  ;;  %3107 = vmatmul.mubr.bf16.vlgmr.msra.gmra.mrb[0].mxu1 %v2822_v5  ;;  %3020 = vmatprep.subr.bf16.mxu0 %v3317_v54  ;;  %v1235_v24 = vrot.slane %v1233_v55, 4  ;;  %v1247_v6 = vshrl.u32 %v4036_v50, 16 }
 0x2c3   : > { %v2885_v51 = vpack.c.bf16 %v999_v25, %v999_v25  ;;  %3115 = vmatpush3.bf16.msra.mxu1 %v3876_v63  ;;  %v1238_v15 = vrot.slane %v1236_v30, 5  ;;  %v1244_v16 = vrot.slane %v1242_v32, 5  ;;  %v1250_v42 = vshll.u32 %v4036_v50, 16  ;;  %v3323_v32 = vld [vmem:[%s4398_s4 + $0x20] sm:$0xff]  }
 0x2c4   : > { %v1069_v26 = vrot.slane %v1067_v47, 7  ;;  %3116 = vmatprep.subr.bf16.mxu1 %v3318_v57  ;;  %v1249_v8 = vrot.slane %v1247_v6, 4  ;;  %v1256_v38 = vshll.u32 %v4048_v41, 16  ;;  %v2791_v56 = vrot.slane %v3984_v53, 9 }
 0x2c5   : > { %v1074_v11 = vshrl.u32 %v2885_v51, 16  ;;  %v1077_v39 = vshll.u32 %v2885_v51, 16  ;;  %3021 = vmatpush3.bf16.msra.mxu0 %v3317_v54  ;;  %v1239_v43 = vor.u32 %v1238_v15, %v1235_v24  ;;  %v1252_v63 = vrot.slane %v1250_v42, 5 }
 0x2c6   : > { %v1072_v28 = vor.u32 %v1070_v48, %v1069_v26  ;;  %3022 = vmatprep.subr.bf16.mxu0 %v3319_v52  ;;  %v1258_v37 = vrot.slane %v1256_v38, 5  ;;  %v1561_v31 = vrot.slane %v3988_v1, 5  ;;  %v4067_v17 = vcombine.low %v3995_v33, %v4010_v14 }
 0x2c7   : > { %v1076_v10 = vrot.slane %v1074_v11, 7  ;;  %3117 = vmatpush3.bf16.msra.mxu1 %v3318_v57  ;;  %v1240_v53 = vrot.slane %v1239_v43, 4  ;;  %v1253_v44 = vor.u32 %v1252_v63, %v1249_v8  ;;  %v2834_v13 = vcombine.low %v3954_v58, %v3995_v33  ;;  %v3334_v33 = vld [vmem:[%s4398_s4 + $0x188] sm:$0xff]  }
 0x2c8   : > { %v1094_v21 = vsel %vm3441_vm3, 0, %v1072_v28  ;;  %3118 = vmatprep.subr.bf16.mxu1 %v3320_v27  ;;  %v4078_v1 = vsel %vm3947_vm2, %v2791_v56, %v1561_v31  ;;  %v4082_v54 = vcombine.low %v3928_v60, %v3963_v34  ;;  %v4086_v36 = vcombine.low %v3975_v62, %v4004_v19 }
 0x2c9   : > { %v4090_v3 = vsel %vm3450_vm5, %v1094_v21, 0  ;;  %v1079_v5 = vor.u32 %v1077_v39, %v1076_v10  ;;  %3023 = vmatpush3.bf16.msra.mxu0 %v3319_v52  ;;  %v1245_v57 = vsel %vm3905_vm15, %v1240_v53, %v1244_v16  ;;  %v1254_v55 = vrot.slane %v1253_v44, 4  ;;  %v3327_v10 = vld [vmem:[%s4398_s4 + $0x30] sm:$0xff]  }
 0x2ca   : > { %v4096_v25 = vcombine.low %v4090_v3, %v4090_v3  ;;  %3024 = vmatprep.subr.bf16.mxu0 %v3321_v12  ;;  %v4098_v30 = vcombine.low %v1231_v22, %v1245_v57  ;;  %v2762_v47 = vcombine.high %v4090_v3, %v4090_v3  ;;  %v2835_v48 = vcombine.low %v4010_v14, %v4078_v1 }
 0x2cb   : > { %v1095_v52 = vsel %vm3441_vm3, 0, %v1079_v5  ;;  %3119 = vmatpush3.bf16.msra.mxu1 %v3320_v27  ;;  %v1259_v24 = vsel %vm3905_vm15, %v1254_v55, %v1258_v37  ;;  %v2792_v22 = vrot.slane %v4014_v35, 9  ;;  %v1565_v6 = vrot.slane %v4032_v23, 5  ;;  %v3325_v27 = vld [vmem:[%s4398_s4 + $0x28] sm:$0xff]  }
 0x2cc   : > { %v4115_v51 = vsel %vm3450_vm5, %v1095_v52, 0  ;;  %3014 = vmatprep.mubr.bf16.mxu0 %v4098_v30  ;;  %3120 = vmatprep.subr.bf16.mxu1 %v3322_v46  ;;  %v2823_v15 = vcombine.low %v1245_v57, %v1259_v24  ;;  %v1261_v16 = vshrl.u32 %v4096_v25, 16  ;;  %v1264_v42 = vshll.u32 %v4096_v25, 16 }
 0x2cd   : > { %v2819_v35 = vcombine.low %v4115_v51, %v4115_v51  ;;  %3025 = vmatpush3.bf16.msra.mxu0 %v3321_v12  ;;  %v1270_v23 = vshll.u32 %v2762_v47, 16  ;;  %v2820_v4 = vcombine.high %v4115_v51, %v4115_v51  ;;  %v4133_v26 = vsel %vm3947_vm2, %v2787_v61, %v1545_v20  ;;  %v3326_v20 = vld [vmem:[%s4398_s4 + $0x168] sm:$0xff]  }
 0x2ce   : > { %3110 = vmatprep.mubr.bf16.mxu1 %v2823_v15  ;;  %3026 = vmatprep.subr.bf16.mxu0 %v3323_v32  ;;  %v1263_v8 = vrot.slane %v1261_v16, 4  ;;  %v1266_v38 = vrot.slane %v1264_v42, 5  ;;  %v2793_v56 = vrot.slane %v4036_v50, 9  ;;  %v1569_v11 = vrot.slane %v4048_v41, 5 }
 0x2cf   : > { %3121 = vmatpush3.bf16.msra.mxu1 %v3322_v46  ;;  %v1879_v59 = vshrl.u32 %v2819_v35, 16  ;;  %v1882_v39 = vshll.u32 %v2819_v35, 16  ;;  %v4144_v61 = vsel %vm3947_vm2, %v2792_v22, %v1565_v6  ;;  %v1888_v63 = vshll.u32 %v2820_v4, 16 }
 0x2d0   : > { %3122 = vmatprep.subr.bf16.mxu1 %v3324_v2  ;;  %v1267_v43 = vor.u32 %v1266_v38, %v1263_v8  ;;  %v4151_v50 = vsel %vm3947_vm2, %v2793_v56, %v1569_v11  ;;  %v4155_v41 = vcombine.low %v4025_v40, %v4090_v3  ;;  %v1272_v28 = vrot.slane %v1270_v23, 5  ;;  %v3330_v38 = vld [vmem:[%s4398_s4 + $0x178] sm:$0xff]   ;;  %v3332_v11 = vld [vmem:[%s4398_s4 + $0x180] sm:$0xff]  }
 0x2d1   : > { %3027 = vmatpush3.bf16.msra.mxu0 %v3323_v32  ;;  %v1881_v12 = vrot.slane %v1879_v59, 4  ;;  %v1884_v37 = vrot.slane %v1882_v39, 5  ;;  %v2836_v31 = vcombine.low %v4144_v61, %v4151_v50  ;;  %v2794_v44 = vrot.slane %v4096_v25, 9  ;;  %v3328_v25 = vld [vmem:[%s4398_s4 + $0x170] sm:$0xff]   ;;  %v3337_v39 = vld [vmem:[%s4398_s4 + $0x98] sm:$0xff]  }
 0x2d2   : > { %3028 = vmatprep.subr.bf16.mxu0 %v3325_v27  ;;  %v1268_v53 = vrot.slane %v1267_v43, 4  ;;  %v1573_v21 = vrot.slane %v2762_v47, 5  ;;  %v2833_v46 = vrot.slane %v2819_v35, 9  ;;  %v2040_v57 = vrot.slane %v2820_v4, 5  ;;  %v3329_v35 = vld [vmem:[%s4398_s4 + $0x38] sm:$0xff]   ;;  %v3336_v59 = vld [vmem:[%s4398_s4 + $0x190] sm:$0xff]  }
 0x2d3   : > { %3123 = vmatpush3.bf16.msra.mxu1 %v3324_v2  ;;  %v1885_v5 = vor.u32 %v1884_v37, %v1881_v12  ;;  %v4165_v55 = vcombine.low %v4078_v1, %v4144_v61  ;;  %v2807_v32 = vcombine.low %v3915_v29, %v3928_v60  ;;  %v1890_v47 = vrot.slane %v1888_v63, 5  ;;  %v3338_v1 = vld [vmem:[%s4398_s4 + $0x198] sm:$0xff]   ;;  %v3341_v61 = vld [vmem:[%s4398_s4 + $0xa8] sm:$0xff]   ;;  %v3344_v43 = vld [vmem:[%s4398_s4 + $0x1b0] sm:$0xff]  }
 0x2d4   : > { %3124 = vmatprep.subr.bf16.mxu1 %v3326_v20  ;;  %v1273_v52 = vsel %vm3905_vm15, %v1268_v53, %v1272_v28  ;;  %v1574_v22 = vsel %vm3947_vm2, %v2794_v44, %v1573_v21  ;;  %v2808_v6 = vcombine.low %v3963_v34, %v3975_v62  ;;  %v4182_v16 = vsel %vm3947_vm2, %v2833_v46, %v2040_v57  ;;  %v3345_v63 = vld [vmem:[%s4398_s4 + $0xb8] sm:$0xff]   ;;  %v3347_v28 = vld [vmem:[%s4398_s4 + $0xc0] sm:$0xff]   ;;  %v3349_v37 = vld [vmem:[%s4398_s4 + $0xc8] sm:$0xff]  }
 0x2d5   : > { %3029 = vmatpush3.bf16.msra.mxu0 %v3325_v27  ;;  %v4178_v15 = vcombine.low %v1259_v24, %v1273_v52  ;;  %v1886_v2 = vrot.slane %v1885_v5, 4  ;;  %v4185_v42 = vcombine.low %v4151_v50, %v1574_v22  ;;  %v2837_v23 = vcombine.low %v1574_v22, %v4182_v16  ;;  %v3346_v50 = vld [vmem:[%s4398_s4 + $0x1b8] sm:$0xff]   ;;  %v3348_v12 = vld [vmem:[%s4398_s4 + $0x1c0] sm:$0xff]   ;;  %v3352_v53 = vld [vmem:[%s4398_s4 + $0x1d0] sm:$0xff]  }
 0x2d6   : > { %3030 = vmatprep.subr.bf16.mxu0 %v3327_v10  ;;  %v2809_v4 = vcombine.low %v4004_v19, %v4025_v40  ;;  %v2810_v24 = vcombine.low %v4090_v3, %v4115_v51  ;;  %v2864_v7 = vcombine.low %v4182_v16, %v4133_v26  ;;  %v2795_v14 = vcombine.low %v4133_v26, %v3954_v58  ;;  %v3340_v58 = vld [vmem:[%s4398_s4 + $0x1a0] sm:$0xff]   ;;  %v3353_v44 = vld [vmem:[%s4398_s4 + $0xd8] sm:$0xff]   ;;  %v3357_v29 = vld [vmem:[%s4398_s4 + $0xe8] sm:$0xff]  }
 0x2d7   : > { %3125 = vmatpush3.bf16.msra.mxu1 %v3326_v20  ;;  %3015 = vmatmul.mubr.bf16.gmra.mrb[20].mxu0 %v4178_v15  ;;  %v4200_v27 = vsel %vm3905_vm15, %v1886_v2, %v1890_v47  ;;  %v3342_v20 = vld [vmem:[%s4398_s4 + $0x1a8] sm:$0xff]   ;;  %v3355_v21 = vld [vmem:[%s4398_s4 + $0xe0] sm:$0xff]   ;;  %v3360_v46 = vld [vmem:[%s4398_s4 + $0x1f0] sm:$0xff]  }
 0x2d8   : > { %3034 = vmatprep.mubr.bf16.mxu0 %v2775_v0  ;;  %3126 = vmatprep.subr.bf16.mxu1 %v3328_v25  ;;  %v2824_v8 = vcombine.low %v1273_v52, %v4200_v27  ;;  %v2855_v56 = vcombine.low %v4200_v27, %v3919_v49  ;;  %v3333_v0 = vld [vmem:[%s4398_s4 + $0x88] sm:$0xff]   ;;  %v3361_v5 = vld [vmem:[%s4398_s4 + $0xf8] sm:$0xff]   ;;  %v3365_v34 = vld [vmem:[%s4398_s4 + $0x210] sm:$0xff]  }
 0x2d9   : > { %3031 = vmatpush3.bf16.msra.mxu0 %v3327_v10  ;;  %v3351_v10 = vld [vmem:[%s4398_s4 + $0xd0] sm:$0xff]   ;;  %v3358_v60 = vld [vmem:[%s4398_s4 + $0x1e8] sm:$0xff]   ;;  %v3362_v57 = vld [vmem:[%s4398_s4 + $0x1f8] sm:$0xff]  }
 0x2da   : > { %3111 = vmatmul.mubr.bf16.gmra.mrb[4].mxu1 %v2824_v8  ;;  %3032 = vmatprep.subr.bf16.mxu0 %v3329_v35  ;;  %v3364_v52 = vld [vmem:[%s4398_s4 + $0x208] sm:$0xff]   ;;  %v3366_v62 = vld [vmem:[%s4398_s4 + $0x218] sm:$0xff]   ;;  %v3367_v19 = vld [vmem:[%s4398_s4 + $0x220] sm:$0xff]  }
 0x2db   : > { %3127 = vmatpush3.bf16.msra.mxu1 %v3328_v25  ;;  %3130 = vmatprep.mubr.bf16.mxu1 %v2834_v13  ;;  %v3335_v13 = vld [vmem:[%s4398_s4 + $0x90] sm:$0xff]   ;;  %v3368_v40 = vld [vmem:[%s4398_s4 + $0x228] sm:$0xff]   ;;  %v2874_v26 = vld [vmem:[%s4400_s6] ss:$0 sm:$0xff] }
 0x2dc   : > { %3128 = vmatprep.subr.bf16.mxu1 %v3330_v38  ;;  %v3369_v49 = vld [vmem:[%s4398_s4 + $0x230] sm:$0xff]  }
 0x2dd   : > { %3033 = vmatpush3.bf16.msra.mxu0 %v3329_v35 }
 0x2de   : > { %3042 = vmatprep.subr.bf16.mxu0 %v3331_v18 }
 0x2df   : > { %3129 = vmatpush3.bf16.msra.mxu1 %v3330_v38 }
 0x2e0   : > { %3035 = vmatmul.mubr.bf16.vlgmr.msra.gmra.mrb[16].mxu0 %v4082_v54  ;;  %3138 = vmatprep.subr.bf16.mxu1 %v3332_v11 }
 0x2e1   : > { %3043 = vmatpush3.bf16.msra.mxu0 %v3331_v18  ;;  %3038 = vmatprep.mubr.bf16.mxu0 %v4086_v36 }
 0x2e2   : > { %3131 = vmatmul.mubr.bf16.vlgmr.msra.gmra.mrb[0].mxu1 %v2835_v48  ;;  %3044 = vmatprep.subr.bf16.mxu0 %v3333_v0  ;;  %v3339_v48 = vld [vmem:[%s4398_s4 + $0xa0] sm:$0xff]  }
 0x2e3   : > { %3139 = vmatpush3.bf16.msra.mxu1 %v3332_v11  ;;  %3134 = vmatprep.mubr.bf16.mxu1 %v2836_v31  ;;  %v3350_v31 = vld [vmem:[%s4398_s4 + $0x1c8] sm:$0xff]  }
 0x2e4   : > { %3140 = vmatprep.subr.bf16.mxu1 %v3334_v33 }
 0x2e5   : > { %3045 = vmatpush3.bf16.msra.mxu0 %v3333_v0 }
 0x2e6   : > { %3046 = vmatprep.subr.bf16.mxu0 %v3335_v13 }
 0x2e7   : > { %3141 = vmatpush3.bf16.msra.mxu1 %v3334_v33 }
 0x2e8   : > { %3039 = vmatmul.mubr.bf16.gmra.mrb[20].mxu0 %v4155_v41  ;;  %3142 = vmatprep.subr.bf16.mxu1 %v3336_v59 }
 0x2e9   : > { %3047 = vmatpush3.bf16.msra.mxu0 %v3335_v13  ;;  %3058 = vmatprep.mubr.bf16.mxu0 %v2795_v14 }
 0x2ea   : > { %3135 = vmatmul.mubr.bf16.gmra.mrb[4].mxu1 %v2837_v23  ;;  %3048 = vmatprep.subr.bf16.mxu0 %v3337_v39 }
 0x2eb   : > { %3143 = vmatpush3.bf16.msra.mxu1 %v3336_v59  ;;  %3154 = vmatprep.mubr.bf16.mxu1 %v4082_v54  ;;  %v3343_v54 = vld [vmem:[%s4398_s4 + $0xb0] sm:$0xff]  }
 0x2ec   : > { %3144 = vmatprep.subr.bf16.mxu1 %v3338_v1 }
 0x2ed   : > { %3049 = vmatpush3.bf16.msra.mxu0 %v3337_v39 }
 0x2ee   : > { %3050 = vmatprep.subr.bf16.mxu0 %v3339_v48 }
 0x2ef   : > { %3145 = vmatpush3.bf16.msra.mxu1 %v3338_v1 }
 0x2f0   : > { %3146 = vmatprep.subr.bf16.mxu1 %v3340_v58 }
 0x2f1   : > { %3051 = vmatpush3.bf16.msra.mxu0 %v3339_v48 }
 0x2f2   : > { %3052 = vmatprep.subr.bf16.mxu0 %v3341_v61 }
 0x2f3   : > { %3147 = vmatpush3.bf16.msra.mxu1 %v3340_v58 }
 0x2f4   : > { %3148 = vmatprep.subr.bf16.mxu1 %v3342_v20 }
 0x2f5   : > { %3053 = vmatpush3.bf16.msra.mxu0 %v3341_v61 }
 0x2f6   : > { %3054 = vmatprep.subr.bf16.mxu0 %v3343_v54 }
 0x2f7   : > { %3149 = vmatpush3.bf16.msra.mxu1 %v3342_v20 }
 0x2f8   : > { %3150 = vmatprep.subr.bf16.mxu1 %v3344_v43 }
 0x2f9   : > { %3055 = vmatpush3.bf16.msra.mxu0 %v3343_v54 }
 0x2fa   : > { %3056 = vmatprep.subr.bf16.mxu0 %v3345_v63 }
 0x2fb   : > { %3151 = vmatpush3.bf16.msra.mxu1 %v3344_v43 }
 0x2fc   : > { %3152 = vmatprep.subr.bf16.mxu1 %v3346_v50 }
 0x2fd   : > { %3057 = vmatpush3.bf16.msra.mxu0 %v3345_v63 }
 0x2fe   : > { %3066 = vmatprep.subr.bf16.mxu0 %v3347_v28 }
 0x2ff   : > { %3153 = vmatpush3.bf16.msra.mxu1 %v3346_v50 }
 0x300   : > { %3059 = vmatmul.mubr.bf16.vlgmr.msra.gmra.mrb[16].mxu0 %v4067_v17  ;;  %3162 = vmatprep.subr.bf16.mxu1 %v3348_v12 }
 0x301   : > { %3062 = vmatprep.mubr.bf16.mxu0 %v4165_v55  ;;  %3067 = vmatpush3.bf16.msra.mxu0 %v3347_v28 }
 0x302   : > { %3155 = vmatmul.mubr.bf16.vlgmr.msra.gmra.mrb[0].mxu1 %v4086_v36  ;;  %3068 = vmatprep.subr.bf16.mxu0 %v3349_v37  ;;  %v2846_v36 = vcombine.low %v4115_v51, %v3458_v9  ;;  %v3356_v9 = vld [vmem:[%s4398_s4 + $0x1e0] sm:$0xff]  }
 0x303   : > { %3158 = vmatprep.mubr.bf16.mxu1 %v4155_v41  ;;  %3163 = vmatpush3.bf16.msra.mxu1 %v3348_v12  ;;  %v3354_v41 = vld [vmem:[%s4398_s4 + $0x1d8] sm:$0xff]  }
 0x304   : > { %3164 = vmatprep.subr.bf16.mxu1 %v3350_v31 }
 0x305   : > { %3069 = vmatpush3.bf16.msra.mxu0 %v3349_v37 }
 0x306   : > { %3070 = vmatprep.subr.bf16.mxu0 %v3351_v10 }
 0x307   : > { %3165 = vmatpush3.bf16.msra.mxu1 %v3350_v31 }
 0x308   : > { %3063 = vmatmul.mubr.bf16.gmra.mrb[20].mxu0 %v4185_v42  ;;  %3166 = vmatprep.subr.bf16.mxu1 %v3352_v53 }
 0x309   : > { %3071 = vmatpush3.bf16.msra.mxu0 %v3351_v10  ;;  %3082 = vmatprep.mubr.bf16.mxu0 %v2807_v32  ;;  %v3363_v32 = vld [vmem:[%s4398_s4 + $0x200] sm:$0xff]  }
 0x30a   : > { %3159 = vmatmul.mubr.bf16.gmra.mrb[4].mxu1 %v2846_v36  ;;  %3072 = vmatprep.subr.bf16.mxu0 %v3353_v44 }
 0x30b   : > { %3167 = vmatpush3.bf16.msra.mxu1 %v3352_v53  ;;  %3178 = vmatprep.mubr.bf16.mxu1 %v4018_v45  ;;  %v3359_v45 = vld [vmem:[%s4398_s4 + $0xf0] sm:$0xff]  }
 0x30c   : > { %3168 = vmatprep.subr.bf16.mxu1 %v3354_v41 }
 0x30d   : > { %3073 = vmatpush3.bf16.msra.mxu0 %v3353_v44 }
 0x30e   : > { %3074 = vmatprep.subr.bf16.mxu0 %v3355_v21 }
 0x30f   : > { %3169 = vmatpush3.bf16.msra.mxu1 %v3354_v41 }
 0x310   : > { %3170 = vmatprep.subr.bf16.mxu1 %v3356_v9 }
 0x311   : > { %3075 = vmatpush3.bf16.msra.mxu0 %v3355_v21 }
 0x312   : > { %3076 = vmatprep.subr.bf16.mxu0 %v3357_v29 }
 0x313   : > { %3171 = vmatpush3.bf16.msra.mxu1 %v3356_v9 }
 0x314   : > { %3172 = vmatprep.subr.bf16.mxu1 %v3358_v60 }
 0x315   : > { %3077 = vmatpush3.bf16.msra.mxu0 %v3357_v29 }
 0x316   : > { %3078 = vmatprep.subr.bf16.mxu0 %v3359_v45 }
 0x317   : > { %3173 = vmatpush3.bf16.msra.mxu1 %v3358_v60 }
 0x318   : > { %3174 = vmatprep.subr.bf16.mxu1 %v3360_v46 }
 0x319   : > { %3079 = vmatpush3.bf16.msra.mxu0 %v3359_v45 }
 0x31a   : > { %3080 = vmatprep.subr.bf16.mxu0 %v3361_v5 }
 0x31b   : > { %3175 = vmatpush3.bf16.msra.mxu1 %v3360_v46 }
 0x31c   : > { %3176 = vmatprep.subr.bf16.mxu1 %v3362_v57 }
 0x31d   : > { %3081 = vmatpush3.bf16.msra.mxu0 %v3361_v5 }
 0x31f   : > { %3177 = vmatpush3.bf16.msra.mxu1 %v3362_v57 }
 0x320   : > { %3083 = vmatmul.mubr.bf16.vlgmr.msra.gmra.mrb[16].mxu0 %v2808_v6  ;;  %3186 = vmatprep.subr.bf16.mxu1 %v3363_v32 }
 0x321   : > { %3086 = vmatprep.mubr.bf16.mxu0 %v2809_v4 }
 0x322   : > { %3179 = vmatmul.mubr.bf16.vlgmr.msra.gmra.mrb[0].mxu1 %v4098_v30 }
 0x323   : > { %3182 = vmatprep.mubr.bf16.mxu1 %v4178_v15  ;;  %3187 = vmatpush3.bf16.msra.mxu1 %v3363_v32 }
 0x324   : > { %3188 = vmatprep.subr.bf16.mxu1 %v3364_v52 }
 0x327   : > { %3189 = vmatpush3.bf16.msra.mxu1 %v3364_v52 }
 0x328   : > { %3087 = vmatmul.mubr.bf16.gmra.mrb[20].mxu0 %v2810_v24  ;;  %3190 = vmatprep.subr.bf16.mxu1 %v3365_v34 }
 0x32a   : > { %3183 = vmatmul.mubr.bf16.gmra.mrb[4].mxu1 %v2855_v56 }
 0x32b   : > { %3191 = vmatpush3.bf16.msra.mxu1 %v3365_v34  ;;  %3202 = vmatprep.mubr.bf16.mxu1 %v4067_v17  ;;  %v3370_v17 = vld [vmem:[%s4398_s4 + $0x238] sm:$0xff]  }
 0x32c   : > { %3192 = vmatprep.subr.bf16.mxu1 %v3366_v62 }
 0x32f   : > { %3193 = vmatpush3.bf16.msra.mxu1 %v3366_v62 }
 0x330   : > { %3194 = vmatprep.subr.bf16.mxu1 %v3367_v19 }
 0x333   : > { %3195 = vmatpush3.bf16.msra.mxu1 %v3367_v19 }
 0x334   : > { %3196 = vmatprep.subr.bf16.mxu1 %v3368_v40 }
 0x337   : > { %3197 = vmatpush3.bf16.msra.mxu1 %v3368_v40 }
 0x338   : > { %3198 = vmatprep.subr.bf16.mxu1 %v3369_v49 }
 0x33b   : > { %3199 = vmatpush3.bf16.msra.mxu1 %v3369_v49 }
 0x33c   : > { %3200 = vmatprep.subr.bf16.mxu1 %v3370_v17 }
 0x33f   : > { %3201 = vmatpush3.bf16.msra.mxu1 %v3370_v17 }
 0x342   : > { %3203 = vmatmul.mubr.bf16.vlgmr.msra.gmra.mrb[0].mxu1 %v4165_v55  ;;  %v2873_v55 = vld [vmem:[%s4399_s5] ss:$0 sm:$0xff] }
 0x343   : > { %3206 = vmatprep.mubr.bf16.mxu1 %v4185_v42 }
 0x34a   : > { %3207 = vmatmul.mubr.bf16.gmra.mrb[4].mxu1 %v2864_v7 }
 0x3f3   : > { %v3084_v3 = vpop.f32.mrb[16].mxu0 }
 0x3f4   : > { %v1836_v30 = vpop.f32.mrb[17].mxu0 }
 0x3f5   : > { %v3085_v51 = vpop.f32.mrb[18].mxu0 }
 0x3f6   : > { %v1839_v25 = vpop.f32.mrb[19].mxu0 }
 0x3fb   : > { %v3088_v47 = vpop.f32.mrb[20].mxu0 }
 0x3fc   : > { %v1852_v22 = vpop.f32.mrb[21].mxu0 }
 0x3fd   : > { %v3089_v6 = vpop.f32.mrb[22].mxu0 }
 0x3fe   : > { %v1855_v15 = vpop.f32.mrb[23].mxu0 }
 0x415   : > { %v3204_v2 = vpop.f32.mrb[0].mxu1 }
 0x416   : > { %v3210_v42 = vadd.f32 %v3204_v2, %v3084_v3  ;;  %v2566_v35 = vpop.f32.mrb[1].mxu1 }
 0x417   : > { %v3211_v16 = vadd.f32 %v2566_v35, %v1836_v30  ;;  %v3205_v23 = vpop.f32.mrb[2].mxu1 }
 0x418   : > { %v2614_v4 = vmul.f32 %v3210_v42, %v2873_v55  ;;  %v3212_v24 = vadd.f32 %v3205_v23, %v3085_v51  ;;  %v2569_v7 = vpop.f32.mrb[3].mxu1 }
 0x419   : > { %v2612_v27 = vmul.f32 %v3211_v16, %v2873_v55  ;;  %v3213_v8 = vadd.f32 %v2569_v7, %v1839_v25 }
 0x41a   : > { %v2629_v38 = vadd.f32 %v2874_v26, %v2614_v4  ;;  %v2615_v56 = vmul.f32 %v3212_v24, %v2873_v55 }
 0x41b   : > { %v2627_v18 = vadd.f32 %v2874_v26, %v2612_v27  ;;  %v2613_v11 = vmul.f32 %v3213_v8, %v2873_v55 }
 0x41c   : > { %v2637_v0 = vmax.f32 %v2629_v38, 0.0  ;;  %v2630_v33 = vadd.f32 %v2874_v26, %v2615_v56 }
 0x41d   : > { %v2635_v13 = vmax.f32 %v2627_v18, 0.0  ;;  %v2628_v59 = vadd.f32 %v2874_v26, %v2613_v11  ;;  %v3208_v39 = vpop.f32.mrb[4].mxu1 }
 0x41e   : > { %2645 = vst [vmem:[%s4381_s20 + $0x10] sm:$0xff] %v2637_v0  ;;  %v2638_v14 = vmax.f32 %v2630_v33, 0.0  ;;  %v3214_v1 = vadd.f32 %v3208_v39, %v3088_v47  ;;  %v2582_v48 = vpop.f32.mrb[5].mxu1 }
 0x41f   : > { %2643 = vst [vmem:[%s4381_s20] sm:$0xff] %v2635_v13  ;;  %v2636_v58 = vmax.f32 %v2628_v59, 0.0  ;;  %v3215_v61 = vadd.f32 %v2582_v48, %v1852_v22  ;;  %v3209_v20 = vpop.f32.mrb[6].mxu1 }
 0x420   : > { %2646 = vst [vmem:[%s4381_s20 + $0x18] sm:$0xff] %v2638_v14  ;;  %v2618_v54 = vmul.f32 %v3214_v1, %v2873_v55  ;;  %v3216_v43 = vadd.f32 %v3209_v20, %v3089_v6  ;;  %v2585_v63 = vpop.f32.mrb[7].mxu1 }
 0x421   : > { %2644 = vst [vmem:[%s4381_s20 + $0x8] sm:$0xff] %v2636_v58  ;;  %v2616_v50 = vmul.f32 %v3215_v61, %v2873_v55  ;;  %v3217_v28 = vadd.f32 %v2585_v63, %v1855_v15 }
 0x422   : > { %v2633_v12 = vadd.f32 %v2874_v26, %v2618_v54  ;;  %v2619_v37 = vmul.f32 %v3216_v43, %v2873_v55 }
 0x423   : > { %v2631_v31 = vadd.f32 %v2874_v26, %v2616_v50  ;;  %v2617_v10 = vmul.f32 %v3217_v28, %v2873_v55 }
 0x424   : > { %v2641_v53 = vmax.f32 %v2633_v12, 0.0  ;;  %v2634_v44 = vadd.f32 %v2874_v26, %v2619_v37 }
 0x425   : > { %v2639_v36 = vmax.f32 %v2631_v31, 0.0  ;;  %v2632_v41 = vadd.f32 %v2874_v26, %v2617_v10 }
 0x426   : > { %2649 = vst [vmem:[%s4381_s20 + $0x30] sm:$0xff] %v2641_v53  ;;  %v2642_v21 = vmax.f32 %v2634_v44, 0.0 }
 0x427   : > { %2647 = vst [vmem:[%s4381_s20 + $0x20] sm:$0xff] %v2639_v36  ;;  %v2640_v9 = vmax.f32 %v2632_v41, 0.0 }
 0x428   : > { %2650 = vst [vmem:[%s4381_s20 + $0x38] sm:$0xff] %v2642_v21 }
 0x429   : > { %2648 = vst [vmem:[%s4381_s20 + $0x28] sm:$0xff] %v2640_v9 }
 0x42a PF: > { %s17_s24 = sadd.s32 1, %s3377_s24  }
 0x42b   : > { %p14_p5 = scmp.ge.s32.totalorder %s17_s24, 4  }
 0x42d   :  { %16 = sbr.rel (!%p14_p5) target bundleno = 1 (0x1), region = 78 }

</bundles_post_ra>
